<compile_context>
chip_gen: v6e
topology: v6e:2x2x1
jax: 0.10.0
libtpu: 0.0.40
codegen_flags: <defaults>
</compile_context>

<pallas_src>
import numpy as np
import jax
import jax.numpy as jnp
from jax.experimental import pallas as pl
from jax.experimental.pallas import tpu as pltpu


def _embedder_kernel(x_ref, w1_ref, b1_ref, w2_ref, b2_ref, o_ref):
    # x_ref:  (TM, c_in)     row tile of the flattened input
    # w1_ref: (c_in, c_out)  b1_ref: (1, c_out)  [biases pre-cast to f32]
    # w2_ref: (c_out, c_out) b2_ref: (1, c_out)
    # o_ref:  (TM, c_out)
    # Explicitly unify operand dtypes before each dot (avoids implicit
    # promotion to a slow multi-pass f32 matmul on v5e/v7x); accumulate in f32.
    x = x_ref[...].astype(w1_ref.dtype)
    h = jnp.dot(x, w1_ref[...], preferred_element_type=jnp.float32)
    h = jnp.maximum(h + b1_ref[...], 0.0)                 # bias + ReLU in f32 (VPU)
    y = jnp.dot(h.astype(w2_ref.dtype), w2_ref[...],
                preferred_element_type=jnp.float32)
    y = y + b2_ref[...]
    o_ref[...] = y.astype(o_ref.dtype)


def _choose_row_tile(rows, row_tile):
    """rows <= row_tile -> single block (grid = 1, minimal per-step overhead).
    Otherwise a 256-aligned tile capped at row_tile; the ragged final grid
    block is masked by Pallas, so correctness is unaffected."""
    if rows <= row_tile:
        return rows
    tm = (min(row_tile, rows) // 256) * 256
    return max(256, tm)


def _make_specs(tm, c_in, c_out, single_buffer_weights):
    # Weights/biases never change across the grid (constant index_map); with
    # Buffered(1) they are held in a single resident VMEM copy.
    wkw = dict(pipeline_mode=pl.Buffered(1)) if single_buffer_weights else {}
    in_specs = [
        pl.BlockSpec((tm, c_in), lambda i: (i, 0)),
        pl.BlockSpec((c_in, c_out), lambda i: (0, 0), **wkw),
        pl.BlockSpec((1, c_out), lambda i: (0, 0), **wkw),
        pl.BlockSpec((c_out, c_out), lambda i: (0, 0), **wkw),
        pl.BlockSpec((1, c_out), lambda i: (0, 0), **wkw),
    ]
    out_spec = pl.BlockSpec((tm, c_out), lambda i: (i, 0))
    return in_specs, out_spec


def template_angle_embedder(x, w1, b1, w2, b2, *, row_tile=1024,
                            compute_dtype=None, out_dtype=None):
    """x: [*, N_templ, N_res, c_in] -> [*, N_templ, N_res, c_out]

    compute_dtype: optional dtype for the MXU dots (e.g. jnp.bfloat16); weights
        are cast once here, the x tile is cast in-kernel.  None = native dtype.
    out_dtype: output dtype (default: x.dtype).
    """
    *lead, c_in = x.shape
    c_out = w1.shape[-1]
    rows = 1
    for d in lead:
        rows *= d

    out_dtype = np.dtype(x.dtype) if out_dtype is None else np.dtype(out_dtype)
    if compute_dtype is not None:
        w1 = w1.astype(compute_dtype)
        w2 = w2.astype(compute_dtype)
    # Biases in f32: the add happens on the f32 accumulator (VPU), not the MXU.
    b1f = b1.reshape(1, c_out).astype(jnp.float32)
    b2f = b2.reshape(1, c_out).astype(jnp.float32)
    x2 = x.reshape(rows, c_in)            # contiguous reshape: no copy

    tm = _choose_row_tile(rows, row_tile)
    grid = (pl.cdiv(rows, tm),)           # ragged tail masked by Pallas

    # Advisory cost hint so XLA can overlap this tiny call with its neighbors.
    flops = 2 * rows * (c_in + c_out) * c_out
    param_bytes = sum(int(a.size) * a.dtype.itemsize for a in (w1, b1f, w2, b2f))
    bytes_accessed = (int(x2.size) * x2.dtype.itemsize
                      + rows * c_out * out_dtype.itemsize
                      + param_bytes)
    cost = pl.CostEstimate(flops=flops, transcendentals=0,
                           bytes_accessed=bytes_accessed)

    def _run(single_buffer_weights):
        in_specs, out_spec = _make_specs(tm, c_in, c_out, single_buffer_weights)
        return pl.pallas_call(
            _embedder_kernel,
            out_shape=jax.ShapeDtypeStruct((rows, c_out), out_dtype),
            grid_spec=pltpu.PrefetchScalarGridSpec(
                num_scalar_prefetch=0,
                grid=grid,
                in_specs=in_specs,
                out_specs=out_spec,
            ),
            compiler_params=pltpu.CompilerParams(
                dimension_semantics=("parallel",)),
            cost_estimate=cost,
        )(x2, w1, b1f, w2, b2f)

    try:
        out = _run(True)
    except Exception:
        # Narrow fallback: some JAX versions may not accept single-buffered
        # (Buffered(1)) BlockSpecs; default double-buffering is still correct.
        out = _run(False)

    return out.reshape(*lead, c_out)


def _init_params(key, c_in, c_out, dtype=jnp.float32):
    # Deterministic synthetic init (PyTorch Linear(init='relu') ~ He init,
    # bias zeros). Shapes match the module's __init__.
    k1, k2 = jax.random.split(key)
    w1 = (jax.random.normal(k1, (c_in, c_out), dtype)
          * jnp.sqrt(2.0 / c_in).astype(dtype))
    b1 = jnp.zeros((c_out,), dtype)
    w2 = (jax.random.normal(k2, (c_out, c_out), dtype)
          * jnp.sqrt(2.0 / c_out).astype(dtype))
    b2 = jnp.zeros((c_out,), dtype)
    return w1, b1, w2, b2


if __name__ == "__main__":
    key = jax.random.PRNGKey(0)
    kx1, kx2, kp = jax.random.split(key, 3)

    # OpenFold-realistic feature sizes: template_angle_feat c_in=57, c_out=256
    # (lane-dense 256-wide output stores).
    c_in, c_out = 57, 256
    w1, b1, w2, b2 = _init_params(kp, c_in, c_out)

    # Case 1: small input -> rows = 2*4*17 = 136 <= row_tile -> single grid
    # step, native f32 path.  Exact module semantics.
    x_small = jax.random.normal(kx1, (2, 4, 17, c_in), jnp.float32)
    out1 = jax.block_until_ready(
        template_angle_embedder(x_small, w1, b1, w2, b2))
    ref1 = jnp.maximum(x_small @ w1 + b1, 0.0) @ w2 + b2
    assert out1.shape == (2, 4, 17, c_out) and out1.dtype == x_small.dtype
    assert jnp.allclose(out1, ref1, atol=2e-3, rtol=2e-3)

    # Case 2: larger input -> rows = 2*4*320 = 2560 > row_tile=1024 -> 3 grid
    # steps (1024/1024/512 ragged tail), bf16 weights + bf16 output (halves
    # the dominant output-store HBM traffic, full-rate MXU on v5e/v7x).
    x_large = jax.random.normal(kx2, (2, 4, 320, c_in), jnp.float32)
    out2 = jax.block_until_ready(
        template_angle_embedder(x_large, w1, b1, w2, b2,
                                compute_dtype=jnp.bfloat16,
                                out_dtype=jnp.bfloat16))
    ref2 = jnp.maximum(x_large @ w1 + b1, 0.0) @ w2 + b2
    assert out2.shape == (2, 4, 320, c_out) and out2.dtype == jnp.bfloat16
    assert jnp.allclose(out2.astype(jnp.float32), ref2, atol=5e-2, rtol=5e-2)

    print("KERNEL_OK")
</pallas_src>

<mosaic_0001>
module attributes {stable_mosaic.version = 11 : i64} {
  func.func @_embedder_kernel(%arg0: i32, %arg1: memref<136x57xf32, #tpu.memory_space<vmem>>, %arg2: memref<57x256xf32, #tpu.memory_space<vmem>>, %arg3: memref<1x256xf32, #tpu.memory_space<vmem>>, %arg4: memref<256x256xf32, #tpu.memory_space<vmem>>, %arg5: memref<1x256xf32, #tpu.memory_space<vmem>>, %arg6: memref<136x256xf32, #tpu.memory_space<vmem>>) attributes {dimension_semantics = [#tpu.dimension_semantics<parallel>], iteration_bounds = array<i64: 1>, scalar_prefetch = 0 : i64, scratch_operands = 0 : i64, tpu.core_type = #tpu.core_type<tc>, window_params = [{transform_indices = @transform_0, window_bounds = array<i64: 136, 57>}, {pipeline_mode = #tpu.pipeline_mode<synchronous>, transform_indices = @transform_1, window_bounds = array<i64: 57, 256>}, {pipeline_mode = #tpu.pipeline_mode<synchronous>, transform_indices = @transform_2, window_bounds = array<i64: 1, 256>}, {pipeline_mode = #tpu.pipeline_mode<synchronous>, transform_indices = @transform_3, window_bounds = array<i64: 256, 256>}, {pipeline_mode = #tpu.pipeline_mode<synchronous>, transform_indices = @transform_4, window_bounds = array<i64: 1, 256>}, {transform_indices = @transform_5, window_bounds = array<i64: 136, 256>}]} {
    %c0 = arith.constant 0 : index
    %c0_0 = arith.constant 0 : index
    %0 = vector.load %arg1[%c0, %c0_0] : memref<136x57xf32, #tpu.memory_space<vmem>>, vector<136x57xf32>
    %c0_1 = arith.constant 0 : index
    %c0_2 = arith.constant 0 : index
    %1 = vector.load %arg2[%c0_1, %c0_2] : memref<57x256xf32, #tpu.memory_space<vmem>>, vector<57x256xf32>
    %cst = arith.constant dense<0.000000e+00> : vector<136x256xf32>
    %2 = tpu.matmul %0, %1, %cst {dimension_numbers = #tpu.dot_dimension_numbers<[1], [0], [0], [1], [0, 0, 1, 1], [], []>} : vector<136x57xf32>, vector<57x256xf32>, vector<136x256xf32> -> vector<136x256xf32>
    %c0_3 = arith.constant 0 : index
    %c0_4 = arith.constant 0 : index
    %3 = vector.load %arg3[%c0_3, %c0_4] : memref<1x256xf32, #tpu.memory_space<vmem>>, vector<1x256xf32>
    %4 = vector.broadcast %3 : vector<1x256xf32> to vector<136x256xf32>
    %5 = arith.addf %2, %4 : vector<136x256xf32>
    %cst_5 = arith.constant 0.000000e+00 : f32
    %6 = vector.broadcast %cst_5 : f32 to vector<136x256xf32>
    %7 = arith.maximumf %5, %6 : vector<136x256xf32>
    %c0_6 = arith.constant 0 : index
    %c0_7 = arith.constant 0 : index
    %8 = vector.load %arg4[%c0_6, %c0_7] : memref<256x256xf32, #tpu.memory_space<vmem>>, vector<256x256xf32>
    %cst_8 = arith.constant dense<0.000000e+00> : vector<136x256xf32>
    %9 = tpu.matmul %7, %8, %cst_8 {dimension_numbers = #tpu.dot_dimension_numbers<[1], [0], [0], [1], [0, 0, 1, 1], [], []>} : vector<136x256xf32>, vector<256x256xf32>, vector<136x256xf32> -> vector<136x256xf32>
    %c0_9 = arith.constant 0 : index
    %c0_10 = arith.constant 0 : index
    %10 = vector.load %arg5[%c0_9, %c0_10] : memref<1x256xf32, #tpu.memory_space<vmem>>, vector<1x256xf32>
    %11 = vector.broadcast %10 : vector<1x256xf32> to vector<136x256xf32>
    %12 = arith.addf %9, %11 : vector<136x256xf32>
    %c0_11 = arith.constant 0 : index
    %c0_12 = arith.constant 0 : index
    %13 = vector.load %arg6[%c0_11, %c0_12] : memref<136x256xf32, #tpu.memory_space<vmem>>, vector<136x256xf32>
    tpu.vector_store %arg6[%c0_11, %c0_12], %12 {strides = array<i32>} : memref<136x256xf32, #tpu.memory_space<vmem>>, vector<136x256xf32>,
    return
  }
  func.func @transform_0(%arg0: i32) -> (i32, i32) {
    %c0_i32 = arith.constant 0 : i32
    %c0_i32_0 = arith.constant 0 : i32
    return %arg0, %c0_i32 : i32, i32
  }
  func.func @transform_1(%arg0: i32) -> (i32, i32) {
    %c0_i32 = arith.constant 0 : i32
    %c0_i32_0 = arith.constant 0 : i32
    %c0_i32_1 = arith.constant 0 : i32
    return %c0_i32, %c0_i32_0 : i32, i32
  }
  func.func @transform_2(%arg0: i32) -> (i32, i32) {
    %c0_i32 = arith.constant 0 : i32
    %c0_i32_0 = arith.constant 0 : i32
    %c0_i32_1 = arith.constant 0 : i32
    return %c0_i32, %c0_i32_0 : i32, i32
  }
  func.func @transform_3(%arg0: i32) -> (i32, i32) {
    %c0_i32 = arith.constant 0 : i32
    %c0_i32_0 = arith.constant 0 : i32
    %c0_i32_1 = arith.constant 0 : i32
    return %c0_i32, %c0_i32_0 : i32, i32
  }
  func.func @transform_4(%arg0: i32) -> (i32, i32) {
    %c0_i32 = arith.constant 0 : i32
    %c0_i32_0 = arith.constant 0 : i32
    %c0_i32_1 = arith.constant 0 : i32
    return %c0_i32, %c0_i32_0 : i32, i32
  }
  func.func @transform_5(%arg0: i32) -> (i32, i32) {
    %c0_i32 = arith.constant 0 : i32
    %c0_i32_0 = arith.constant 0 : i32
    return %arg0, %c0_i32 : i32, i32
  }
}

module attributes {stable_mosaic.version = 11 : i64} {
  func.func @_embedder_kernel(%arg0: i32, %arg1: memref<136x57xf32, #tpu.memory_space<vmem>>, %arg2: memref<57x256xf32, #tpu.memory_space<vmem>>, %arg3: memref<1x256xf32, #tpu.memory_space<vmem>>, %arg4: memref<256x256xf32, #tpu.memory_space<vmem>>, %arg5: memref<1x256xf32, #tpu.memory_space<vmem>>, %arg6: memref<136x256xf32, #tpu.memory_space<vmem>>) attributes {dimension_semantics = [#tpu.dimension_semantics<parallel>], iteration_bounds = array<i64: 1>, scalar_prefetch = 0 : i64, scratch_operands = 0 : i64, tpu.core_type = #tpu.core_type<tc>, window_params = [{transform_indices = @transform_0, window_bounds = array<i64: 136, 57>}, {pipeline_mode = #tpu.pipeline_mode<synchronous>, transform_indices = @transform_1, window_bounds = array<i64: 57, 256>}, {pipeline_mode = #tpu.pipeline_mode<synchronous>, transform_indices = @transform_2, window_bounds = array<i64: 1, 256>}, {pipeline_mode = #tpu.pipeline_mode<synchronous>, transform_indices = @transform_3, window_bounds = array<i64: 256, 256>}, {pipeline_mode = #tpu.pipeline_mode<synchronous>, transform_indices = @transform_4, window_bounds = array<i64: 1, 256>}, {transform_indices = @transform_5, window_bounds = array<i64: 136, 256>}]} {
    %c0 = arith.constant 0 : index
    %c0_0 = arith.constant 0 : index
    %0 = vector.load %arg1[%c0, %c0_0] : memref<136x57xf32, #tpu.memory_space<vmem>>, vector<136x57xf32>
    %c0_1 = arith.constant 0 : index
    %c0_2 = arith.constant 0 : index
    %1 = vector.load %arg2[%c0_1, %c0_2] : memref<57x256xf32, #tpu.memory_space<vmem>>, vector<57x256xf32>
    %cst = arith.constant dense<0.000000e+00> : vector<136x256xf32>
    %2 = tpu.matmul %0, %1, %cst {dimension_numbers = #tpu.dot_dimension_numbers<[1], [0], [0], [1], [0, 0, 1, 1], [], []>} : vector<136x57xf32>, vector<57x256xf32>, vector<136x256xf32> -> vector<136x256xf32>
    %c0_3 = arith.constant 0 : index
    %c0_4 = arith.constant 0 : index
    %3 = vector.load %arg3[%c0_3, %c0_4] : memref<1x256xf32, #tpu.memory_space<vmem>>, vector<1x256xf32>
    %4 = vector.broadcast %3 : vector<1x256xf32> to vector<136x256xf32>
    %5 = arith.addf %2, %4 : vector<136x256xf32>
    %cst_5 = arith.constant 0.000000e+00 : f32
    %6 = vector.broadcast %cst_5 : f32 to vector<136x256xf32>
    %7 = arith.maximumf %5, %6 : vector<136x256xf32>
    %c0_6 = arith.constant 0 : index
    %c0_7 = arith.constant 0 : index
    %8 = vector.load %arg4[%c0_6, %c0_7] : memref<256x256xf32, #tpu.memory_space<vmem>>, vector<256x256xf32>
    %cst_8 = arith.constant dense<0.000000e+00> : vector<136x256xf32>
    %9 = tpu.matmul %7, %8, %cst_8 {dimension_numbers = #tpu.dot_dimension_numbers<[1], [0], [0], [1], [0, 0, 1, 1], [], []>} : vector<136x256xf32>, vector<256x256xf32>, vector<136x256xf32> -> vector<136x256xf32>
    %c0_9 = arith.constant 0 : index
    %c0_10 = arith.constant 0 : index
    %10 = vector.load %arg5[%c0_9, %c0_10] : memref<1x256xf32, #tpu.memory_space<vmem>>, vector<1x256xf32>
    %11 = vector.broadcast %10 : vector<1x256xf32> to vector<136x256xf32>
    %12 = arith.addf %9, %11 : vector<136x256xf32>
    %c0_11 = arith.constant 0 : index
    %c0_12 = arith.constant 0 : index
    %13 = vector.load %arg6[%c0_11, %c0_12] : memref<136x256xf32, #tpu.memory_space<vmem>>, vector<136x256xf32>
    tpu.vector_store %arg6[%c0_11, %c0_12], %12 {strides = array<i32>} : memref<136x256xf32, #tpu.memory_space<vmem>>, vector<136x256xf32>,
    return
  }
  func.func @transform_0(%arg0: i32) -> (i32, i32) {
    %c0_i32 = arith.constant 0 : i32
    %c0_i32_0 = arith.constant 0 : i32
    return %arg0, %c0_i32 : i32, i32
  }
  func.func @transform_1(%arg0: i32) -> (i32, i32) {
    %c0_i32 = arith.constant 0 : i32
    %c0_i32_0 = arith.constant 0 : i32
    %c0_i32_1 = arith.constant 0 : i32
    return %c0_i32, %c0_i32_0 : i32, i32
  }
  func.func @transform_2(%arg0: i32) -> (i32, i32) {
    %c0_i32 = arith.constant 0 : i32
    %c0_i32_0 = arith.constant 0 : i32
    %c0_i32_1 = arith.constant 0 : i32
    return %c0_i32, %c0_i32_0 : i32, i32
  }
  func.func @transform_3(%arg0: i32) -> (i32, i32) {
    %c0_i32 = arith.constant 0 : i32
    %c0_i32_0 = arith.constant 0 : i32
    %c0_i32_1 = arith.constant 0 : i32
    return %c0_i32, %c0_i32_0 : i32, i32
  }
  func.func @transform_4(%arg0: i32) -> (i32, i32) {
    %c0_i32 = arith.constant 0 : i32
    %c0_i32_0 = arith.constant 0 : i32
    %c0_i32_1 = arith.constant 0 : i32
    return %c0_i32, %c0_i32_0 : i32, i32
  }
  func.func @transform_5(%arg0: i32) -> (i32, i32) {
    %c0_i32 = arith.constant 0 : i32
    %c0_i32_0 = arith.constant 0 : i32
    return %arg0, %c0_i32 : i32, i32
  }
}

</mosaic_0001>

<bundles_post_ra>
// kernel: tpu_custom_call.1
= control target key start
LH: loop header
LB: loop body
LE: loop exit
PB: predicated region body
PF: predicated region fallthrough
CT: control target
= control target key end

     0   :  { %10 = vsyncpa [#allocation3], 0  ;;  %s1144_s0 = inlined_call_operand.vmem [shape: f32[136,57], index: 0, kind: input, shape index: {}]   ;;  %s1145_s1 = inlined_call_operand.vmem [shape: f32[57,256], index: 1, kind: input, shape index: {}]   ;;  %s1146_s2 = inlined_call_operand.vmem [shape: f32[1,256], index: 2, kind: input, shape index: {}]   ;;  %s1147_s3 = inlined_call_operand.hbm [shape: f32[256,256], index: 3, kind: input, shape index: {}]   ;;  %s1148_s4 = inlined_call_operand.vmem [shape: f32[1,256], index: 4, kind: input, shape index: {}]   ;;  %s1149_s5 = inlined_call_operand.hbm [shape: f32[136,256], index: 5, kind: output, shape index: {}]  }
   0x1   :  { %11 = vsyncpa [#allocation4], 0  ;;  %s766_s18 = smov [#allocation2]  }
   0x2   :  { %s23_s19 = sshll.u32 %s766_s18, 4  ;;  %s24_s19 = int_to_ptr.vmem [resolvable:$true] %s23_s19 }
   0x3   :  { %s730_s20 = scalar_lea.vmem %s24_s19, 8192  ;;  %p735_p1 = scmp.lt.s32.totalorder %s24_s19, %s24_s19 }
   0x4   :  { %p731_p0 = scmp.ne.s32.totalorder %s24_s19, %s730_s20  ;;  %p736_p2 = scmp.lt.s32.totalorder %s730_s20, %s730_s20 }
   0x6   :  { %p737_p3 = por %p736_p2, %p735_p1 }
   0x8   :  { %p738_p4 = pnand %p737_p3, %p731_p0 }
   0xa   :  { %741 = shalt.err (!%p738_p4)
}
   0xb   :  { %s767_s21 = smov 256   ;;  %s768_s22 = smov 16  }
   0xc   :  { %29 = dma.hbm_to_vmem [thread:$0]  %s1147_s3, 8192, %s24_s19, [#allocation3], %s767_s21, %s767_s21, %s768_s22  }
   0xd   :  { %762 = dma.done.wait [#allocation3], 8192  }
   0xe   :  { %763 = vsyncadd [#allocation3], 4294959104  ;;  %v769_v0 = vmov 0.0   ;;  %vm132_vm0 = vcmask 1040384   ;;  %v67_v1 = vld [vmem:[%s1145_s1 + $0x78] sm:$0x1] }
   0xf   :  { %203 = vmatprep.mubr.f32.mxu0 %v769_v0  ;;  %v66_v2 = vld [vmem:[%s1145_s1 + $0x70] sm:$0x1]  ;;  %v65_v3 = vld [vmem:[%s1145_s1 + $0x68] sm:$0xff]  ;;  %634 = vmatprep.subr.msk.mxu0 %vm132_vm0, %v67_v1  ;;  %v64_v4 = vld [vmem:[%s1145_s1 + $0x60] sm:$0xff]  ;;  %vm80_vm1 = vcmask 465920  }
  0x10   :  { %635 = vmatpush1.msk.msra.mxu0 %vm132_vm0, %v66_v2  ;;  %v63_v5 = vld [vmem:[%s1145_s1 + $0x58] sm:$0xff]  ;;  %v62_v6 = vld [vmem:[%s1145_s1 + $0x50] sm:$0xff]  ;;  %v61_v7 = vld [vmem:[%s1145_s1 + $0x48] sm:$0xff] }
  0x11   :  { %157 = vmatprep.subr.mxu0 %v65_v3  ;;  %v60_v8 = vld [vmem:[%s1145_s1 + $0x40] sm:$0xff]  ;;  %v59_v9 = vld [vmem:[%s1145_s1 + $0x38] sm:$0xff]  ;;  %v58_v10 = vld [vmem:[%s1145_s1 + $0x30] sm:$0xff] }
  0x12   :  { %158 = vmatpush1.msra.mxu0 %v64_v4  ;;  %v57_v11 = vld [vmem:[%s1145_s1 + $0x28] sm:$0xff]  ;;  %v56_v12 = vld [vmem:[%s1145_s1 + $0x20] sm:$0xff]  ;;  %v55_v13 = vld [vmem:[%s1145_s1 + $0x18] sm:$0xff] }
  0x13   :  { %159 = vmatprep.subr.mxu0 %v63_v5  ;;  %v54_v14 = vld [vmem:[%s1145_s1 + $0x10] sm:$0xff]  ;;  %v371_v15 = vld [vmem:[#allocation2 + $0xf8] sm:$0xff]  ;;  %v53_v16 = vld [vmem:[%s1145_s1 + $0x8] sm:$0xff] }
  0x14   :  { %160 = vmatpush1.msra.mxu0 %v62_v6  ;;  %v370_v17 = vld [vmem:[#allocation2 + $0xf0] sm:$0xff]  ;;  %653 = vmatprep.subr.mxu1 %v371_v15  ;;  %v52_v18 = vld [vmem:[%s1145_s1] sm:$0xff]  ;;  %v369_v19 = vld [vmem:[#allocation2 + $0xe8] sm:$0xff] }
  0x15   :  { %161 = vmatprep.subr.mxu0 %v61_v7  ;;  %685 = vmatpush1.msra.mxu1 %v370_v17  ;;  %v35_v20 = vld [vmem:[%s1144_s0] sm:$0xff]  ;;  %v367_v22 = vld [vmem:[#allocation2 + $0xd8] sm:$0xff]  ;;  %v36_v23 = vld [vmem:[%s1144_s0 + $0x8] sm:$0xff] }
  0x16   :  { %162 = vmatpush1.msra.mxu0 %v60_v8  ;;  %v368_v21 = vld [vmem:[#allocation2 + $0xe0] sm:$0xff]  ;;  %654 = vmatprep.subr.mxu1 %v369_v19  ;;  %v366_v24 = vld [vmem:[#allocation2 + $0xd0] sm:$0xff]  ;;  %v365_v25 = vld [vmem:[#allocation2 + $0xc8] sm:$0xff] }
  0x17   :  { %163 = vmatprep.subr.mxu0 %v59_v9  ;;  %686 = vmatpush1.msra.mxu1 %v368_v21  ;;  %v364_v26 = vld [vmem:[#allocation2 + $0xc0] sm:$0xff]  ;;  %v37_v27 = vld [vmem:[%s1144_s0 + $0x10] sm:$0xff]  ;;  %v363_v28 = vld [vmem:[#allocation2 + $0xb8] sm:$0xff] }
  0x18   :  { %164 = vmatpush1.msra.mxu0 %v58_v10  ;;  %655 = vmatprep.subr.mxu1 %v367_v22  ;;  %v362_v29 = vld [vmem:[#allocation2 + $0xb0] sm:$0xff]  ;;  %v361_v30 = vld [vmem:[#allocation2 + $0xa8] sm:$0xff]  ;;  %v360_v31 = vld [vmem:[#allocation2 + $0xa0] sm:$0xff] }
  0x19   :  { %165 = vmatprep.subr.mxu0 %v57_v11  ;;  %687 = vmatpush1.msra.mxu1 %v366_v24  ;;  %v38_v32 = vld [vmem:[%s1144_s0 + $0x18] sm:$0xff]  ;;  %v358_v34 = vld [vmem:[#allocation2 + $0x90] sm:$0xff]  ;;  %v357_v35 = vld [vmem:[#allocation2 + $0x88] sm:$0xff] }
  0x1a   :  { %166 = vmatpush1.msra.mxu0 %v56_v12  ;;  %656 = vmatprep.subr.mxu1 %v365_v25  ;;  %v359_v33 = vld [vmem:[#allocation2 + $0x98] sm:$0xff]  ;;  %v356_v36 = vld [vmem:[#allocation2 + $0x80] sm:$0xff]  ;;  %v354_v39 = vld [vmem:[#allocation2 + $0x70] sm:$0xff] }
  0x1b   :  { %167 = vmatprep.subr.mxu0 %v55_v13  ;;  %688 = vmatpush1.msra.mxu1 %v364_v26  ;;  %v39_v37 = vld [vmem:[%s1144_s0 + $0x20] sm:$0xff]  ;;  %v355_v38 = vld [vmem:[#allocation2 + $0x78] sm:$0xff]  ;;  %v353_v40 = vld [vmem:[#allocation2 + $0x68] sm:$0xff] }
  0x1c   :  { %168 = vmatpush1.msra.mxu0 %v54_v14  ;;  %657 = vmatprep.subr.mxu1 %v363_v28  ;;  %v352_v41 = vld [vmem:[#allocation2 + $0x60] sm:$0xff]  ;;  %v40_v42 = vld [vmem:[%s1144_s0 + $0x28] sm:$0xff]  ;;  %v351_v43 = vld [vmem:[#allocation2 + $0x58] sm:$0xff] }
  0x1d   :  { %169 = vmatprep.subr.mxu0 %v53_v16  ;;  %689 = vmatpush1.msra.mxu1 %v362_v29  ;;  %v350_v44 = vld [vmem:[#allocation2 + $0x50] sm:$0xff]  ;;  %v349_v45 = vld [vmem:[#allocation2 + $0x48] sm:$0xff]  ;;  %v348_v46 = vld [vmem:[#allocation2 + $0x40] sm:$0xff] }
  0x1e   :  { %170 = vmatpush1.msra.mxu0 %v52_v18  ;;  %658 = vmatprep.subr.mxu1 %v361_v30  ;;  %v41_v47 = vld [vmem:[%s1144_s0 + $0x30] sm:$0xff]  ;;  %v347_v48 = vld [vmem:[#allocation2 + $0x38] sm:$0xff]  ;;  %v891_v50 = vld [vmem:[#allocation2 + $0x28] sm:$0xff] }
  0x1f   :  { %636 = vmatmul.mubr.msk.f32.vlgmr.msra.gmra.mxu0 %vm80_vm1, %v35_v20  ;;  %416 = vmatprep.subr.mxu0 %v371_v15  ;;  %v889_v49 = vld [vmem:[#allocation2 + $0x30] sm:$0xff]  ;;  %v894_v51 = vld [vmem:[#allocation2 + $0x20] sm:$0xff]  ;;  %v42_v52 = vld [vmem:[%s1144_s0 + $0x38] sm:$0xff] }
  0x20   :  { %209 = vmatprep.mubr.f32.mxu0 %v769_v0  ;;  %417 = vmatpush1.msra.mxu0 %v370_v17  ;;  %v901_v53 = vld [vmem:[#allocation2 + $0x18] sm:$0xff]  ;;  %v904_v54 = vld [vmem:[#allocation2 + $0x10] sm:$0xff]  ;;  %v907_v55 = vld [vmem:[#allocation2 + $0x8] sm:$0xff] }
  0x21   :  { %418 = vmatprep.subr.mxu0 %v369_v19  ;;  %690 = vmatpush1.msra.mxu1 %v360_v31  ;;  %v911_v56 = vld [vmem:[#allocation2] sm:$0xff]  ;;  %v918_v58 = vld [vmem:[#allocation2 + $0x1f8] sm:$0xff]  ;;  %v921_v59 = vld [vmem:[#allocation2 + $0x1f0] sm:$0xff] }
  0x22   :  { %419 = vmatpush1.msra.mxu0 %v368_v21  ;;  %659 = vmatprep.subr.mxu1 %v359_v33  ;;  %v43_v57 = vld [vmem:[%s1144_s0 + $0x40] sm:$0xff]  ;;  %v924_v60 = vld [vmem:[#allocation2 + $0x1e8] sm:$0xff]  ;;  %v935_v63 = vld [vmem:[#allocation2 + $0x1d8] sm:$0xff] }
  0x23   :  { %637 = vmatmul.mubr.msk.f32.gmra.mxu0 %vm80_vm1, %v36_v23  ;;  %420 = vmatprep.subr.mxu0 %v367_v22  ;;  %v928_v61 = vld [vmem:[#allocation2 + $0x1e0] sm:$0xff]  ;;  %v44_v62 = vld [vmem:[%s1144_s0 + $0x48] sm:$0xff]  ;;  %v938_v1 = vld [vmem:[#allocation2 + $0x1d0] sm:$0xff] }
  0x24   :  { %215 = vmatprep.mubr.f32.mxu0 %v769_v0  ;;  %421 = vmatpush1.msra.mxu0 %v366_v24  ;;  %v941_v2 = vld [vmem:[#allocation2 + $0x1c8] sm:$0xff]  ;;  %v945_v3 = vld [vmem:[#allocation2 + $0x1c0] sm:$0xff]  ;;  %v45_v4 = vld [vmem:[%s1144_s0 + $0x50] sm:$0xff] }
  0x25   :  { %422 = vmatprep.subr.mxu0 %v365_v25  ;;  %691 = vmatpush1.msra.mxu1 %v358_v34  ;;  %v952_v5 = vld [vmem:[#allocation2 + $0x1b8] sm:$0xff]  ;;  %v955_v6 = vld [vmem:[#allocation2 + $0x1b0] sm:$0xff]  ;;  %v958_v7 = vld [vmem:[#allocation2 + $0x1a8] sm:$0xff] }
  0x26   :  { %423 = vmatpush1.msra.mxu0 %v364_v26  ;;  %660 = vmatprep.subr.mxu1 %v357_v35  ;;  %v962_v8 = vld [vmem:[#allocation2 + $0x1a0] sm:$0xff]  ;;  %v46_v9 = vld [vmem:[%s1144_s0 + $0x58] sm:$0xff]  ;;  %v972_v11 = vld [vmem:[#allocation2 + $0x190] sm:$0xff] }
  0x27   :  { %638 = vmatmul.mubr.msk.f32.gmra.mxu0 %vm80_vm1, %v37_v27  ;;  %424 = vmatprep.subr.mxu0 %v363_v28  ;;  %v969_v10 = vld [vmem:[#allocation2 + $0x198] sm:$0xff]  ;;  %v976_v12 = vld [vmem:[#allocation2 + $0x188] sm:$0xff]  ;;  %v981_v13 = vld [vmem:[#allocation2 + $0x180] sm:$0xff] }
  0x28   :  { %221 = vmatprep.mubr.f32.mxu0 %v769_v0  ;;  %425 = vmatpush1.msra.mxu0 %v362_v29  ;;  %v47_v14 = vld [vmem:[%s1144_s0 + $0x60] sm:$0xff]  ;;  %v988_v15 = vld [vmem:[#allocation2 + $0x178] sm:$0xff]  ;;  %v991_v16 = vld [vmem:[#allocation2 + $0x170] sm:$0xff] }
  0x29   :  { %426 = vmatprep.subr.mxu0 %v361_v30  ;;  %692 = vmatpush1.msra.mxu1 %v356_v36  ;;  %v995_v17 = vld [vmem:[#allocation2 + $0x168] sm:$0xff]  ;;  %v384_v18 = vld [vmem:[#allocation2 + $0x160] sm:$0xff]  ;;  %v383_v20 = vld [vmem:[#allocation2 + $0x158] sm:$0xff] }
  0x2a   :  { %427 = vmatpush1.msra.mxu0 %v360_v31  ;;  %661 = vmatprep.subr.mxu1 %v355_v38  ;;  %v48_v19 = vld [vmem:[%s1144_s0 + $0x68] sm:$0xff]  ;;  %v382_v21 = vld [vmem:[#allocation2 + $0x150] sm:$0xff]  ;;  %v380_v23 = vld [vmem:[#allocation2 + $0x140] sm:$0xff] }
  0x2b   :  { %639 = vmatmul.mubr.msk.f32.gmra.mxu0 %vm80_vm1, %v38_v32  ;;  %428 = vmatprep.subr.mxu0 %v359_v33  ;;  %v381_v22 = vld [vmem:[#allocation2 + $0x148] sm:$0xff]  ;;  %v49_v24 = vld [vmem:[%s1144_s0 + $0x70] sm:$0xff]  ;;  %v50_v25 = vld [vmem:[%s1144_s0 + $0x78] sm:$0xff] }
  0x2c   :  { %227 = vmatprep.mubr.f32.mxu0 %v769_v0  ;;  %429 = vmatpush1.msra.mxu0 %v358_v34  ;;  %v51_v26 = vld [vmem:[%s1144_s0 + $0x80] sm:$0xff]  ;;  %v379_v27 = vld [vmem:[#allocation2 + $0x138] sm:$0xff]  ;;  %v378_v28 = vld [vmem:[#allocation2 + $0x130] sm:$0xff]  ;;  %v70_v34 = vlaneseq }
  0x2d   :  { %430 = vmatprep.subr.mxu0 %v357_v35  ;;  %693 = vmatpush1.msra.mxu1 %v354_v39  ;;  %v377_v29 = vld [vmem:[#allocation2 + $0x128] sm:$0xff]  ;;  %v375_v30 = vld [vmem:[#allocation2 + $0x118] sm:$0xff]  ;;  %v374_v31 = vld [vmem:[#allocation2 + $0x110] sm:$0xff] }
  0x2e   :  { %431 = vmatpush1.msra.mxu0 %v356_v36  ;;  %662 = vmatprep.subr.mxu1 %v353_v40  ;;  %v373_v32 = vld [vmem:[#allocation2 + $0x108] sm:$0xff]  ;;  %v372_v33 = vld [vmem:[#allocation2 + $0x100] sm:$0xff]  ;;  %v1044_v35 = vshrl.u32 %v70_v34, 7 }
  0x2f   :  { %640 = vmatmul.mubr.msk.f32.gmra.mxu0 %vm80_vm1, %v39_v37  ;;  %432 = vmatprep.subr.mxu0 %v355_v38  ;;  %v68_v37 = vld [vmem:[%s1146_s2] sm:$0x3] }
  0x30   :  { %233 = vmatprep.mubr.f32.mxu0 %v769_v0  ;;  %433 = vmatpush1.msra.mxu0 %v354_v39  ;;  %v72_v36 = vsub.s32 0, %v1044_v35  ;;  %v76_v38 = vsub.s32 1, %v1044_v35 }
  0x31   :  { %434 = vmatprep.subr.mxu0 %v353_v40  ;;  %694 = vmatpush1.msra.mxu1 %v352_v41 }
  0x32   :  { %435 = vmatpush1.msra.mxu0 %v352_v41  ;;  %663 = vmatprep.subr.mxu1 %v351_v43  ;;  %v1053_v39 = vrot.slane %v68_v37, %v72_v36  ;;  %v1057_v40 = vrot.slane %v68_v37, %v76_v38 }
  0x33   :  { %641 = vmatmul.mubr.msk.f32.gmra.mxu0 %vm80_vm1, %v40_v42  ;;  %436 = vmatprep.subr.mxu0 %v351_v43 }
  0x34   :  { %239 = vmatprep.mubr.f32.mxu0 %v769_v0  ;;  %437 = vmatpush1.msra.mxu0 %v350_v44 }
  0x35   :  { %438 = vmatprep.subr.mxu0 %v349_v45  ;;  %695 = vmatpush1.msra.mxu1 %v350_v44 }
  0x36   :  { %439 = vmatpush1.msra.mxu0 %v348_v46  ;;  %664 = vmatprep.subr.mxu1 %v349_v45 }
  0x37   :  { %642 = vmatmul.mubr.msk.f32.gmra.mxu0 %vm80_vm1, %v41_v47  ;;  %440 = vmatprep.subr.mxu0 %v347_v48 }
  0x38   :  { %245 = vmatprep.mubr.f32.mxu0 %v769_v0  ;;  %441 = vmatpush1.msra.mxu0 %v889_v49 }
  0x39   :  { %442 = vmatprep.subr.mxu0 %v891_v50  ;;  %696 = vmatpush1.msra.mxu1 %v348_v46 }
  0x3a   :  { %443 = vmatpush1.msra.mxu0 %v894_v51  ;;  %665 = vmatprep.subr.mxu1 %v347_v48 }
  0x3b   :  { %643 = vmatmul.mubr.msk.f32.gmra.mxu0 %vm80_vm1, %v42_v52  ;;  %444 = vmatprep.subr.mxu0 %v901_v53 }
  0x3c   :  { %251 = vmatprep.mubr.f32.mxu0 %v769_v0  ;;  %445 = vmatpush1.msra.mxu0 %v904_v54 }
  0x3d   :  { %446 = vmatprep.subr.mxu0 %v907_v55  ;;  %697 = vmatpush1.msra.mxu1 %v889_v49 }
  0x3e   :  { %447 = vmatpush1.msra.mxu0 %v911_v56  ;;  %666 = vmatprep.subr.mxu1 %v891_v50 }
  0x3f   :  { %644 = vmatmul.mubr.msk.f32.gmra.mxu0 %vm80_vm1, %v43_v57  ;;  %448 = vmatprep.subr.mxu0 %v918_v58 }
  0x40   :  { %257 = vmatprep.mubr.f32.mxu0 %v769_v0  ;;  %449 = vmatpush2.msra.mxu0 %v921_v59 }
  0x41   :  { %450 = vmatprep.subr.mxu0 %v924_v60  ;;  %698 = vmatpush1.msra.mxu1 %v894_v51 }
  0x42   :  { %451 = vmatpush2.msra.mxu0 %v928_v61  ;;  %667 = vmatprep.subr.mxu1 %v901_v53 }
  0x43   :  { %645 = vmatmul.mubr.msk.f32.gmra.mxu0 %vm80_vm1, %v44_v62  ;;  %452 = vmatprep.subr.mxu0 %v935_v63 }
  0x44   :  { %263 = vmatprep.mubr.f32.mxu0 %v769_v0  ;;  %453 = vmatpush2.msra.mxu0 %v938_v1 }
  0x45   :  { %454 = vmatprep.subr.mxu0 %v941_v2  ;;  %699 = vmatpush1.msra.mxu1 %v904_v54 }
  0x46   :  { %455 = vmatpush2.msra.mxu0 %v945_v3  ;;  %668 = vmatprep.subr.mxu1 %v907_v55 }
  0x47   :  { %646 = vmatmul.mubr.msk.f32.gmra.mxu0 %vm80_vm1, %v45_v4  ;;  %456 = vmatprep.subr.mxu0 %v952_v5 }
  0x48   :  { %269 = vmatprep.mubr.f32.mxu0 %v769_v0  ;;  %457 = vmatpush2.msra.mxu0 %v955_v6 }
  0x49   :  { %458 = vmatprep.subr.mxu0 %v958_v7  ;;  %700 = vmatpush1.msra.mxu1 %v911_v56 }
  0x4a   :  { %459 = vmatpush2.msra.mxu0 %v962_v8  ;;  %669 = vmatprep.subr.mxu1 %v918_v58 }
  0x4b   :  { %647 = vmatmul.mubr.msk.f32.gmra.mxu0 %vm80_vm1, %v46_v9  ;;  %460 = vmatprep.subr.mxu0 %v969_v10 }
  0x4c   :  { %275 = vmatprep.mubr.f32.mxu0 %v769_v0  ;;  %461 = vmatpush2.msra.mxu0 %v972_v11 }
  0x4d   :  { %462 = vmatprep.subr.mxu0 %v976_v12  ;;  %701 = vmatpush2.msra.mxu1 %v921_v59 }
  0x4e   :  { %463 = vmatpush2.msra.mxu0 %v981_v13  ;;  %670 = vmatprep.subr.mxu1 %v924_v60 }
  0x4f   :  { %648 = vmatmul.mubr.msk.f32.gmra.mxu0 %vm80_vm1, %v47_v14  ;;  %464 = vmatprep.subr.mxu0 %v988_v15 }
  0x50   :  { %281 = vmatprep.mubr.f32.mxu0 %v769_v0  ;;  %465 = vmatpush2.msra.mxu0 %v991_v16 }
  0x51   :  { %466 = vmatprep.subr.mxu0 %v995_v17  ;;  %702 = vmatpush2.msra.mxu1 %v928_v61 }
  0x52   :  { %467 = vmatpush2.msra.mxu0 %v384_v18  ;;  %671 = vmatprep.subr.mxu1 %v935_v63 }
  0x53   :  { %649 = vmatmul.mubr.msk.f32.gmra.mxu0 %vm80_vm1, %v48_v19  ;;  %468 = vmatprep.subr.mxu0 %v383_v20 }
  0x54   :  { %287 = vmatprep.mubr.f32.mxu0 %v769_v0  ;;  %469 = vmatpush2.msra.mxu0 %v382_v21 }
  0x55   :  { %470 = vmatprep.subr.mxu0 %v381_v22  ;;  %703 = vmatpush2.msra.mxu1 %v938_v1 }
  0x56   :  { %471 = vmatpush2.msra.mxu0 %v380_v23  ;;  %672 = vmatprep.subr.mxu1 %v941_v2 }
  0x57   :  { %650 = vmatmul.mubr.msk.f32.gmra.mxu0 %vm80_vm1, %v49_v24  ;;  %704 = vmatpush2.msra.mxu1 %v945_v3 }
  0x58   :  { %293 = vmatprep.mubr.f32.mxu0 %v769_v0  ;;  %673 = vmatprep.subr.mxu1 %v952_v5 }
  0x59   :  { %472 = vmatprep.subr.mxu0 %v379_v27  ;;  %705 = vmatpush2.msra.mxu1 %v955_v6 }
  0x5a   :  { %473 = vmatpush2.msra.mxu0 %v378_v28  ;;  %674 = vmatprep.subr.mxu1 %v958_v7 }
  0x5b   :  { %651 = vmatmul.mubr.msk.f32.gmra.mxu0 %vm80_vm1, %v50_v25  ;;  %474 = vmatprep.subr.mxu0 %v377_v29 }
  0x5c   :  { %299 = vmatprep.mubr.f32.mxu0 %v769_v0  ;;  %v376_v0 = vld [vmem:[#allocation2 + $0x120] sm:$0xff]  ;;  %706 = vmatpush2.msra.mxu1 %v962_v8 }
  0x5d   :  { %475 = vmatpush2.msra.mxu0 %v376_v0  ;;  %675 = vmatprep.subr.mxu1 %v969_v10 }
  0x5e   :  { %476 = vmatprep.subr.mxu0 %v375_v30  ;;  %707 = vmatpush2.msra.mxu1 %v972_v11 }
  0x5f   :  { %652 = vmatmul.mubr.msk.f32.gmra.mxu0 %vm80_vm1, %v51_v26  ;;  %676 = vmatprep.subr.mxu1 %v976_v12 }
  0x60   :  { %477 = vmatpush2.msra.mxu0 %v374_v31  ;;  %708 = vmatpush2.msra.mxu1 %v981_v13 }
  0x61   :  { %478 = vmatprep.subr.mxu0 %v373_v32  ;;  %677 = vmatprep.subr.mxu1 %v988_v15 }
  0x62   :  { %479 = vmatpush2.msra.mxu0 %v372_v33  ;;  %709 = vmatpush2.msra.mxu1 %v991_v16 }
  0x63   :  { %678 = vmatprep.subr.mxu1 %v995_v17 }
  0x64   :  { %710 = vmatpush2.msra.mxu1 %v384_v18 }
  0x65   :  { %679 = vmatprep.subr.mxu1 %v383_v20 }
  0x66   :  { %711 = vmatpush2.msra.mxu1 %v382_v21 }
  0x67   :  { %680 = vmatprep.subr.mxu1 %v381_v22 }
  0x68   :  { %712 = vmatpush2.msra.mxu1 %v380_v23 }
  0x69   :  { %681 = vmatprep.subr.mxu1 %v379_v27 }
  0x6a   :  { %713 = vmatpush2.msra.mxu1 %v378_v28 }
  0x6b   :  { %682 = vmatprep.subr.mxu1 %v377_v29 }
  0x6c   :  { %714 = vmatpush2.msra.mxu1 %v376_v0 }
  0x6d   :  { %683 = vmatprep.subr.mxu1 %v375_v30 }
  0x6e   :  { %715 = vmatpush2.msra.mxu1 %v374_v31 }
  0x6f   :  { %684 = vmatprep.subr.mxu1 %v373_v32 }
  0x70   :  { %716 = vmatpush2.msra.mxu1 %v372_v33 }
  0xdf   :  { %v205_v41 = vpop.f32.mrf.mxu0 }
  0xe0   :  { %v206_v42 = vadd.f32 %v205_v41, %v1053_v39 }
  0xe1   :  { %v207_v43 = vpop.f32.mrf.mxu0 }
  0xe2   :  { %v208_v44 = vadd.f32 %v207_v43, %v1057_v40  ;;  %v306_v47 = vmax.f32 %v206_v42, 0.0 }
  0xe3   :  { %v211_v45 = vpop.f32.mrf.mxu0 }
  0xe4   :  { %v307_v46 = vmax.f32 %v208_v44, 0.0  ;;  %v212_v48 = vadd.f32 %v211_v45, %v1053_v39 }
  0xe5   :  { %v213_v49 = vpop.f32.mrf.mxu0 }
  0xe6   :  { %v214_v50 = vadd.f32 %v213_v49, %v1057_v40  ;;  %480 = vmatprep.mubr.f32.mxu0 %v307_v46  ;;  %v308_v53 = vmax.f32 %v212_v48, 0.0 }
  0xe7   :  { %v217_v51 = vpop.f32.mrf.mxu0  ;;  %481 = vmatmul.mubr.f32.vlgmr.msra.gmra.mxu0 %v306_v47 }
  0xe8   :  { %v309_v52 = vmax.f32 %v214_v50, 0.0  ;;  %v218_v54 = vadd.f32 %v217_v51, %v1053_v39 }
  0xe9   :  { %v219_v55 = vpop.f32.mrf.mxu0 }
  0xea   :  { %v220_v56 = vadd.f32 %v219_v55, %v1057_v40  ;;  %486 = vmatprep.mubr.f32.mxu0 %v309_v52  ;;  %v310_v59 = vmax.f32 %v218_v54, 0.0 }
  0xeb   :  { %v223_v57 = vpop.f32.mrf.mxu0  ;;  %487 = vmatmul.mubr.f32.gmra.mxu0 %v308_v53 }
  0xec   :  { %v311_v58 = vmax.f32 %v220_v56, 0.0  ;;  %v224_v60 = vadd.f32 %v223_v57, %v1053_v39 }
  0xed   :  { %v225_v61 = vpop.f32.mrf.mxu0 }
  0xee   :  { %v226_v62 = vadd.f32 %v225_v61, %v1057_v40  ;;  %492 = vmatprep.mubr.f32.mxu0 %v311_v58  ;;  %v312_v2 = vmax.f32 %v224_v60, 0.0 }
  0xef   :  { %v229_v63 = vpop.f32.mrf.mxu0  ;;  %493 = vmatmul.mubr.f32.gmra.mxu0 %v310_v59 }
  0xf0   :  { %v313_v1 = vmax.f32 %v226_v62, 0.0  ;;  %v230_v3 = vadd.f32 %v229_v63, %v1053_v39 }
  0xf1   :  { %v231_v4 = vpop.f32.mrf.mxu0 }
  0xf2   :  { %v232_v5 = vadd.f32 %v231_v4, %v1057_v40  ;;  %498 = vmatprep.mubr.f32.mxu0 %v313_v1  ;;  %v314_v8 = vmax.f32 %v230_v3, 0.0 }
  0xf3   :  { %v235_v6 = vpop.f32.mrf.mxu0  ;;  %499 = vmatmul.mubr.f32.gmra.mxu0 %v312_v2 }
  0xf4   :  { %v315_v7 = vmax.f32 %v232_v5, 0.0  ;;  %v236_v9 = vadd.f32 %v235_v6, %v1053_v39 }
  0xf5   :  { %v237_v10 = vpop.f32.mrf.mxu0 }
  0xf6   :  { %v238_v11 = vadd.f32 %v237_v10, %v1057_v40  ;;  %504 = vmatprep.mubr.f32.mxu0 %v315_v7  ;;  %v316_v14 = vmax.f32 %v236_v9, 0.0 }
  0xf7   :  { %v241_v12 = vpop.f32.mrf.mxu0  ;;  %505 = vmatmul.mubr.f32.gmra.mxu0 %v314_v8 }
  0xf8   :  { %v317_v13 = vmax.f32 %v238_v11, 0.0  ;;  %v242_v15 = vadd.f32 %v241_v12, %v1053_v39 }
  0xf9   :  { %v243_v16 = vpop.f32.mrf.mxu0 }
  0xfa   :  { %510 = vmatprep.mubr.f32.mxu0 %v317_v13  ;;  %v244_v17 = vadd.f32 %v243_v16, %v1057_v40  ;;  %v318_v20 = vmax.f32 %v242_v15, 0.0 }
  0xfb   :  { %v247_v18 = vpop.f32.mrf.mxu0  ;;  %511 = vmatmul.mubr.f32.gmra.mxu0 %v316_v14 }
  0xfc   :  { %v319_v19 = vmax.f32 %v244_v17, 0.0  ;;  %v248_v21 = vadd.f32 %v247_v18, %v1053_v39 }
  0xfd   :  { %v249_v22 = vpop.f32.mrf.mxu0 }
  0xfe   :  { %v250_v23 = vadd.f32 %v249_v22, %v1057_v40  ;;  %516 = vmatprep.mubr.f32.mxu1 %v319_v19  ;;  %v320_v26 = vmax.f32 %v248_v21, 0.0  ;;  %v404_v21 = vld [vmem:[%s1148_s4] sm:$0x3]  ;;  %s770_s4 = smov [#allocation5]  }
  0xff   :  { %v253_v24 = vpop.f32.mrf.mxu0  ;;  %517 = vmatmul.mubr.f32.vlgmr.msra.gmra.mxu1 %v318_v20  ;;  %v1098_v22 = vrot.slane %v404_v21, %v72_v36  ;;  %s622_s17 = sshll.u32 %s770_s4, 4  ;;  %s623_s17 = int_to_ptr.vmem [resolvable:$true] %s622_s17 }
 0x100   :  { %v321_v25 = vmax.f32 %v250_v23, 0.0  ;;  %v254_v27 = vadd.f32 %v253_v24, %v1053_v39  ;;  %s742_s18 = scalar_lea.vmem %s623_s17, 4352  ;;  %p747_p6 = scmp.lt.s32.totalorder %s623_s17, %s623_s17 }
 0x101   :  { %v255_v28 = vpop.f32.mrf.mxu0  ;;  %p743_p5 = scmp.ne.s32.totalorder %s623_s17, %s742_s18  ;;  %p748_p7 = scmp.lt.s32.totalorder %s742_s18, %s742_s18 }
 0x102   :  { %v256_v29 = vadd.f32 %v255_v28, %v1057_v40  ;;  %522 = vmatprep.mubr.f32.mxu1 %v321_v25  ;;  %v322_v31 = vmax.f32 %v254_v27, 0.0 }
 0x103   :  { %v259_v0 = vpop.f32.mrf.mxu0  ;;  %523 = vmatmul.mubr.f32.gmra.mxu1 %v320_v26  ;;  %p749_p8 = por %p748_p7, %p747_p6 }
 0x104   :  { %v323_v30 = vmax.f32 %v256_v29, 0.0  ;;  %v260_v32 = vadd.f32 %v259_v0, %v1053_v39 }
 0x105   :  { %v261_v33 = vpop.f32.mrf.mxu0  ;;  %p750_p9 = pnand %p749_p8, %p743_p5 }
 0x106   :  { %v262_v34 = vadd.f32 %v261_v33, %v1057_v40  ;;  %528 = vmatprep.mubr.f32.mxu1 %v323_v30  ;;  %v324_v42 = vmax.f32 %v260_v32, 0.0 }
 0x107   :  { %v265_v37 = vpop.f32.mrf.mxu0  ;;  %529 = vmatmul.mubr.f32.gmra.mxu1 %v322_v31 }
 0x108   :  { %v325_v41 = vmax.f32 %v262_v34, 0.0  ;;  %v266_v43 = vadd.f32 %v265_v37, %v1053_v39 }
 0x109   :  { %v267_v44 = vpop.f32.mrf.mxu0 }
 0x10a   :  { %v268_v45 = vadd.f32 %v267_v44, %v1057_v40  ;;  %534 = vmatprep.mubr.f32.mxu1 %v325_v41  ;;  %v326_v48 = vmax.f32 %v266_v43, 0.0 }
 0x10b   :  { %v271_v46 = vpop.f32.mrf.mxu0  ;;  %535 = vmatmul.mubr.f32.gmra.mxu1 %v324_v42 }
 0x10c   :  { %v327_v47 = vmax.f32 %v268_v45, 0.0  ;;  %v272_v49 = vadd.f32 %v271_v46, %v1053_v39 }
 0x10d   :  { %v273_v50 = vpop.f32.mrf.mxu0 }
 0x10e   :  { %v274_v51 = vadd.f32 %v273_v50, %v1057_v40  ;;  %540 = vmatprep.mubr.f32.mxu1 %v327_v47  ;;  %v328_v54 = vmax.f32 %v272_v49, 0.0 }
 0x10f   :  { %v277_v52 = vpop.f32.mrf.mxu0  ;;  %541 = vmatmul.mubr.f32.gmra.mxu1 %v326_v48 }
 0x110   :  { %v329_v53 = vmax.f32 %v274_v51, 0.0  ;;  %v278_v55 = vadd.f32 %v277_v52, %v1053_v39 }
 0x111   :  { %v279_v56 = vpop.f32.mrf.mxu0 }
 0x112   :  { %v280_v57 = vadd.f32 %v279_v56, %v1057_v40  ;;  %546 = vmatprep.mubr.f32.mxu1 %v329_v53  ;;  %v330_v60 = vmax.f32 %v278_v55, 0.0 }
 0x113   :  { %v283_v58 = vpop.f32.mrf.mxu0  ;;  %547 = vmatmul.mubr.f32.gmra.mxu1 %v328_v54 }
 0x114   :  { %v331_v59 = vmax.f32 %v280_v57, 0.0  ;;  %v284_v61 = vadd.f32 %v283_v58, %v1053_v39 }
 0x115   :  { %v285_v62 = vpop.f32.mrf.mxu0 }
 0x116   :  { %v286_v63 = vadd.f32 %v285_v62, %v1057_v40  ;;  %552 = vmatprep.mubr.f32.mxu1 %v331_v59  ;;  %v332_v3 = vmax.f32 %v284_v61, 0.0 }
 0x117   :  { %v289_v1 = vpop.f32.mrf.mxu0  ;;  %553 = vmatmul.mubr.f32.gmra.mxu1 %v330_v60 }
 0x118   :  { %v333_v2 = vmax.f32 %v286_v63, 0.0  ;;  %v290_v4 = vadd.f32 %v289_v1, %v1053_v39 }
 0x119   :  { %v291_v5 = vpop.f32.mrf.mxu0 }
 0x11a   :  { %v292_v6 = vadd.f32 %v291_v5, %v1057_v40  ;;  %558 = vmatprep.mubr.f32.mxu1 %v333_v2  ;;  %v334_v9 = vmax.f32 %v290_v4, 0.0 }
 0x11b   :  { %v295_v7 = vpop.f32.mrf.mxu0  ;;  %559 = vmatmul.mubr.f32.gmra.mxu1 %v332_v3 }
 0x11c   :  { %v335_v8 = vmax.f32 %v292_v6, 0.0  ;;  %v296_v10 = vadd.f32 %v295_v7, %v1053_v39 }
 0x11d   :  { %v297_v11 = vpop.f32.mrf.mxu0 }
 0x11e   :  { %v298_v12 = vadd.f32 %v297_v11, %v1057_v40  ;;  %564 = vmatprep.mubr.f32.mxu1 %v335_v8  ;;  %v336_v15 = vmax.f32 %v296_v10, 0.0 }
 0x11f   :  { %v301_v13 = vpop.f32.mrf.mxu0  ;;  %565 = vmatmul.mubr.f32.gmra.mxu1 %v334_v9 }
 0x120   :  { %v337_v14 = vmax.f32 %v298_v12, 0.0  ;;  %v302_v16 = vadd.f32 %v301_v13, %v1053_v39  ;;  %v1102_v39 = vrot.slane %v404_v21, %v76_v38 }
 0x121   :  { %v303_v17 = vpop.f32.mrf.mxu0 }
 0x122   :  { %v304_v18 = vadd.f32 %v303_v17, %v1057_v40  ;;  %570 = vmatprep.mubr.f32.mxu1 %v337_v14  ;;  %v338_v20 = vmax.f32 %v302_v16, 0.0 }
 0x123   :  { %571 = vmatmul.mubr.f32.gmra.mxu1 %v336_v15 }
 0x124   :  { %v339_v19 = vmax.f32 %v304_v18, 0.0 }
 0x126   :  { %576 = vmatprep.mubr.f32.mxu1 %v339_v19 }
 0x127   :  { %577 = vmatmul.mubr.f32.gmra.mxu1 %v338_v20 }
 0x1a7   :  { %v482_v23 = vpop.f32.mrf.mxu0 }
 0x1a8   :  { %v483_v40 = vadd.f32 %v482_v23, %v1098_v22 }
 0x1a9   :  { %v484_v24 = vpop.f32.mrf.mxu0 }
 0x1aa   :  { %583 = vst [vmem:[#allocation5] sm:$0xff] %v483_v40  ;;  %v485_v25 = vadd.f32 %v484_v24, %v1102_v39 }
 0x1ab   :  { %v488_v26 = vpop.f32.mrf.mxu0 }
 0x1ac   :  { %584 = vst [vmem:[#allocation5 + $0x8] sm:$0xff] %v485_v25  ;;  %v489_v27 = vadd.f32 %v488_v26, %v1098_v22 }
 0x1ad   :  { %v490_v28 = vpop.f32.mrf.mxu0 }
 0x1ae   :  { %585 = vst [vmem:[#allocation5 + $0x10] sm:$0xff] %v489_v27  ;;  %v491_v36 = vadd.f32 %v490_v28, %v1102_v39 }
 0x1af   :  { %v494_v29 = vpop.f32.mrf.mxu0 }
 0x1b0   :  { %586 = vst [vmem:[#allocation5 + $0x18] sm:$0xff] %v491_v36  ;;  %v495_v35 = vadd.f32 %v494_v29, %v1098_v22 }
 0x1b1   :  { %v496_v38 = vpop.f32.mrf.mxu0 }
 0x1b2   :  { %587 = vst [vmem:[#allocation5 + $0x20] sm:$0xff] %v495_v35  ;;  %v497_v0 = vadd.f32 %v496_v38, %v1102_v39 }
 0x1b3   :  { %v500_v30 = vpop.f32.mrf.mxu0 }
 0x1b4   :  { %588 = vst [vmem:[#allocation5 + $0x28] sm:$0xff] %v497_v0  ;;  %v501_v31 = vadd.f32 %v500_v30, %v1098_v22 }
 0x1b5   :  { %v502_v32 = vpop.f32.mrf.mxu0 }
 0x1b6   :  { %589 = vst [vmem:[#allocation5 + $0x30] sm:$0xff] %v501_v31  ;;  %v503_v33 = vadd.f32 %v502_v32, %v1102_v39 }
 0x1b7   :  { %v506_v34 = vpop.f32.mrf.mxu0 }
 0x1b8   :  { %590 = vst [vmem:[#allocation5 + $0x38] sm:$0xff] %v503_v33  ;;  %v507_v37 = vadd.f32 %v506_v34, %v1098_v22 }
 0x1b9   :  { %v508_v41 = vpop.f32.mrf.mxu0 }
 0x1ba   :  { %591 = vst [vmem:[#allocation5 + $0x40] sm:$0xff] %v507_v37  ;;  %v509_v42 = vadd.f32 %v508_v41, %v1102_v39 }
 0x1bb   :  { %v512_v43 = vpop.f32.mrf.mxu0 }
 0x1bc   :  { %592 = vst [vmem:[#allocation5 + $0x48] sm:$0xff] %v509_v42  ;;  %v513_v44 = vadd.f32 %v512_v43, %v1098_v22 }
 0x1bd   :  { %v514_v45 = vpop.f32.mrf.mxu0 }
 0x1be   :  { %593 = vst [vmem:[#allocation5 + $0x50] sm:$0xff] %v513_v44  ;;  %v515_v46 = vadd.f32 %v514_v45, %v1102_v39 }
 0x1bf   :  { %v518_v47 = vpop.f32.mrf.mxu1 }
 0x1c0   :  { %594 = vst [vmem:[#allocation5 + $0x58] sm:$0xff] %v515_v46  ;;  %v519_v48 = vadd.f32 %v518_v47, %v1098_v22 }
 0x1c1   :  { %v520_v49 = vpop.f32.mrf.mxu1 }
 0x1c2   :  { %595 = vst [vmem:[#allocation5 + $0x60] sm:$0xff] %v519_v48  ;;  %v521_v50 = vadd.f32 %v520_v49, %v1102_v39 }
 0x1c3   :  { %v524_v51 = vpop.f32.mrf.mxu1 }
 0x1c4   :  { %596 = vst [vmem:[#allocation5 + $0x68] sm:$0xff] %v521_v50  ;;  %v525_v52 = vadd.f32 %v524_v51, %v1098_v22 }
 0x1c5   :  { %v526_v53 = vpop.f32.mrf.mxu1 }
 0x1c6   :  { %597 = vst [vmem:[#allocation5 + $0x70] sm:$0xff] %v525_v52  ;;  %v527_v54 = vadd.f32 %v526_v53, %v1102_v39 }
 0x1c7   :  { %v530_v55 = vpop.f32.mrf.mxu1 }
 0x1c8   :  { %598 = vst [vmem:[#allocation5 + $0x78] sm:$0xff] %v527_v54  ;;  %v531_v56 = vadd.f32 %v530_v55, %v1098_v22 }
 0x1c9   :  { %v532_v57 = vpop.f32.mrf.mxu1 }
 0x1ca   :  { %599 = vst [vmem:[#allocation5 + $0x80] sm:$0xff] %v531_v56  ;;  %v533_v58 = vadd.f32 %v532_v57, %v1102_v39 }
 0x1cb   :  { %v536_v59 = vpop.f32.mrf.mxu1 }
 0x1cc   :  { %600 = vst [vmem:[#allocation5 + $0x88] sm:$0xff] %v533_v58  ;;  %v537_v60 = vadd.f32 %v536_v59, %v1098_v22 }
 0x1cd   :  { %v538_v61 = vpop.f32.mrf.mxu1 }
 0x1ce   :  { %601 = vst [vmem:[#allocation5 + $0x90] sm:$0xff] %v537_v60  ;;  %v539_v62 = vadd.f32 %v538_v61, %v1102_v39 }
 0x1cf   :  { %v542_v63 = vpop.f32.mrf.mxu1 }
 0x1d0   :  { %602 = vst [vmem:[#allocation5 + $0x98] sm:$0xff] %v539_v62  ;;  %v543_v1 = vadd.f32 %v542_v63, %v1098_v22 }
 0x1d1   :  { %v544_v2 = vpop.f32.mrf.mxu1 }
 0x1d2   :  { %603 = vst [vmem:[#allocation5 + $0xa0] sm:$0xff] %v543_v1  ;;  %v545_v3 = vadd.f32 %v544_v2, %v1102_v39 }
 0x1d3   :  { %v548_v4 = vpop.f32.mrf.mxu1 }
 0x1d4   :  { %604 = vst [vmem:[#allocation5 + $0xa8] sm:$0xff] %v545_v3  ;;  %v549_v5 = vadd.f32 %v548_v4, %v1098_v22 }
 0x1d5   :  { %v550_v6 = vpop.f32.mrf.mxu1 }
 0x1d6   :  { %605 = vst [vmem:[#allocation5 + $0xb0] sm:$0xff] %v549_v5  ;;  %v551_v7 = vadd.f32 %v550_v6, %v1102_v39 }
 0x1d7   :  { %v554_v8 = vpop.f32.mrf.mxu1 }
 0x1d8   :  { %606 = vst [vmem:[#allocation5 + $0xb8] sm:$0xff] %v551_v7  ;;  %v555_v9 = vadd.f32 %v554_v8, %v1098_v22 }
 0x1d9   :  { %v556_v10 = vpop.f32.mrf.mxu1 }
 0x1da   :  { %607 = vst [vmem:[#allocation5 + $0xc0] sm:$0xff] %v555_v9  ;;  %v557_v11 = vadd.f32 %v556_v10, %v1102_v39 }
 0x1db   :  { %v560_v12 = vpop.f32.mrf.mxu1 }
 0x1dc   :  { %608 = vst [vmem:[#allocation5 + $0xc8] sm:$0xff] %v557_v11  ;;  %v561_v13 = vadd.f32 %v560_v12, %v1098_v22 }
 0x1dd   :  { %v562_v14 = vpop.f32.mrf.mxu1 }
 0x1de   :  { %609 = vst [vmem:[#allocation5 + $0xd0] sm:$0xff] %v561_v13  ;;  %v563_v15 = vadd.f32 %v562_v14, %v1102_v39 }
 0x1df   :  { %v566_v16 = vpop.f32.mrf.mxu1 }
 0x1e0   :  { %610 = vst [vmem:[#allocation5 + $0xd8] sm:$0xff] %v563_v15  ;;  %v567_v17 = vadd.f32 %v566_v16, %v1098_v22 }
 0x1e1   :  { %v568_v18 = vpop.f32.mrf.mxu1 }
 0x1e2   :  { %611 = vst [vmem:[#allocation5 + $0xe0] sm:$0xff] %v567_v17  ;;  %v569_v19 = vadd.f32 %v568_v18, %v1102_v39 }
 0x1e3   :  { %v572_v20 = vpop.f32.mrf.mxu1 }
 0x1e4   :  { %612 = vst [vmem:[#allocation5 + $0xe8] sm:$0xff] %v569_v19  ;;  %v573_v21 = vadd.f32 %v572_v20, %v1098_v22 }
 0x1e5   :  { %v574_v23 = vpop.f32.mrf.mxu1 }
 0x1e6   :  { %613 = vst [vmem:[#allocation5 + $0xf0] sm:$0xff] %v573_v21  ;;  %v575_v40 = vadd.f32 %v574_v23, %v1102_v39 }
 0x1e7   :  { %v578_v24 = vpop.f32.mrf.mxu1 }
 0x1e8   :  { %614 = vst [vmem:[#allocation5 + $0xf8] sm:$0xff] %v575_v40  ;;  %v579_v25 = vadd.f32 %v578_v24, %v1098_v22 }
 0x1e9   :  { %v580_v26 = vpop.f32.mrf.mxu1 }
 0x1ea   :  { %615 = vst [vmem:[#allocation5 + $0x100] sm:$0xff] %v579_v25  ;;  %v581_v27 = vadd.f32 %v580_v26, %v1102_v39 }
 0x1ec   :  { %616 = vst [vmem:[#allocation5 + $0x108] sm:$0xff] %v581_v27 }
 0x1ed   :  { %753 = shalt.err (!%p750_p9)
}
 0x1ee   :  { %628 = dma.vmem_to_hbm [thread:$0]  %s623_s17, 4352, %s1149_s5, [#allocation4], %s767_s21, %s767_s21, %s768_s22  }
 0x1ef   :  { %764 = dma.done.wait [#allocation4], 4352  }
 0x1f0   :  { %765 = vsyncadd [#allocation4], 4294962944 }
 0x1f1   :  { %632 = vsyncpa [#allocation3], 1 }
 0x1f2   :  { %633 = vsyncpa [#allocation4], 1 }

// kernel: tpu_custom_call.1
= control target key start
LH: loop header
LB: loop body
LE: loop exit
PB: predicated region body
PF: predicated region fallthrough
CT: control target
= control target key end

     0   :  { %10 = vsyncpa [#allocation3], 0  ;;  %s1144_s0 = inlined_call_operand.vmem [shape: f32[136,57], index: 0, kind: input, shape index: {}]   ;;  %s1145_s1 = inlined_call_operand.vmem [shape: f32[57,256], index: 1, kind: input, shape index: {}]   ;;  %s1146_s2 = inlined_call_operand.vmem [shape: f32[1,256], index: 2, kind: input, shape index: {}]   ;;  %s1147_s3 = inlined_call_operand.hbm [shape: f32[256,256], index: 3, kind: input, shape index: {}]   ;;  %s1148_s4 = inlined_call_operand.vmem [shape: f32[1,256], index: 4, kind: input, shape index: {}]   ;;  %s1149_s5 = inlined_call_operand.hbm [shape: f32[136,256], index: 5, kind: output, shape index: {}]  }
   0x1   :  { %11 = vsyncpa [#allocation4], 0  ;;  %s766_s18 = smov [#allocation2]  }
   0x2   :  { %s23_s19 = sshll.u32 %s766_s18, 4  ;;  %s24_s19 = int_to_ptr.vmem [resolvable:$true] %s23_s19 }
   0x3   :  { %s730_s20 = scalar_lea.vmem %s24_s19, 8192  ;;  %p735_p1 = scmp.lt.s32.totalorder %s24_s19, %s24_s19 }
   0x4   :  { %p731_p0 = scmp.ne.s32.totalorder %s24_s19, %s730_s20  ;;  %p736_p2 = scmp.lt.s32.totalorder %s730_s20, %s730_s20 }
   0x6   :  { %p737_p3 = por %p736_p2, %p735_p1 }
   0x8   :  { %p738_p4 = pnand %p737_p3, %p731_p0 }
   0xa   :  { %741 = shalt.err (!%p738_p4)
}
   0xb   :  { %s767_s21 = smov 256   ;;  %s768_s22 = smov 16  }
   0xc   :  { %29 = dma.hbm_to_vmem [thread:$0]  %s1147_s3, 8192, %s24_s19, [#allocation3], %s767_s21, %s767_s21, %s768_s22  }
   0xd   :  { %762 = dma.done.wait [#allocation3], 8192  }
   0xe   :  { %763 = vsyncadd [#allocation3], 4294959104  ;;  %v769_v0 = vmov 0.0   ;;  %vm132_vm0 = vcmask 1040384   ;;  %v67_v1 = vld [vmem:[%s1145_s1 + $0x78] sm:$0x1] }
   0xf   :  { %203 = vmatprep.mubr.f32.mxu0 %v769_v0  ;;  %v66_v2 = vld [vmem:[%s1145_s1 + $0x70] sm:$0x1]  ;;  %v65_v3 = vld [vmem:[%s1145_s1 + $0x68] sm:$0xff]  ;;  %634 = vmatprep.subr.msk.mxu0 %vm132_vm0, %v67_v1  ;;  %v64_v4 = vld [vmem:[%s1145_s1 + $0x60] sm:$0xff]  ;;  %vm80_vm1 = vcmask 465920  }
  0x10   :  { %635 = vmatpush1.msk.msra.mxu0 %vm132_vm0, %v66_v2  ;;  %v63_v5 = vld [vmem:[%s1145_s1 + $0x58] sm:$0xff]  ;;  %v62_v6 = vld [vmem:[%s1145_s1 + $0x50] sm:$0xff]  ;;  %v61_v7 = vld [vmem:[%s1145_s1 + $0x48] sm:$0xff] }
  0x11   :  { %157 = vmatprep.subr.mxu0 %v65_v3  ;;  %v60_v8 = vld [vmem:[%s1145_s1 + $0x40] sm:$0xff]  ;;  %v59_v9 = vld [vmem:[%s1145_s1 + $0x38] sm:$0xff]  ;;  %v58_v10 = vld [vmem:[%s1145_s1 + $0x30] sm:$0xff] }
  0x12   :  { %158 = vmatpush1.msra.mxu0 %v64_v4  ;;  %v57_v11 = vld [vmem:[%s1145_s1 + $0x28] sm:$0xff]  ;;  %v56_v12 = vld [vmem:[%s1145_s1 + $0x20] sm:$0xff]  ;;  %v55_v13 = vld [vmem:[%s1145_s1 + $0x18] sm:$0xff] }
  0x13   :  { %159 = vmatprep.subr.mxu0 %v63_v5  ;;  %v54_v14 = vld [vmem:[%s1145_s1 + $0x10] sm:$0xff]  ;;  %v371_v15 = vld [vmem:[#allocation2 + $0xf8] sm:$0xff]  ;;  %v53_v16 = vld [vmem:[%s1145_s1 + $0x8] sm:$0xff] }
  0x14   :  { %160 = vmatpush1.msra.mxu0 %v62_v6  ;;  %v370_v17 = vld [vmem:[#allocation2 + $0xf0] sm:$0xff]  ;;  %653 = vmatprep.subr.mxu1 %v371_v15  ;;  %v52_v18 = vld [vmem:[%s1145_s1] sm:$0xff]  ;;  %v369_v19 = vld [vmem:[#allocation2 + $0xe8] sm:$0xff] }
  0x15   :  { %161 = vmatprep.subr.mxu0 %v61_v7  ;;  %685 = vmatpush1.msra.mxu1 %v370_v17  ;;  %v35_v20 = vld [vmem:[%s1144_s0] sm:$0xff]  ;;  %v367_v22 = vld [vmem:[#allocation2 + $0xd8] sm:$0xff]  ;;  %v36_v23 = vld [vmem:[%s1144_s0 + $0x8] sm:$0xff] }
  0x16   :  { %162 = vmatpush1.msra.mxu0 %v60_v8  ;;  %v368_v21 = vld [vmem:[#allocation2 + $0xe0] sm:$0xff]  ;;  %654 = vmatprep.subr.mxu1 %v369_v19  ;;  %v366_v24 = vld [vmem:[#allocation2 + $0xd0] sm:$0xff]  ;;  %v365_v25 = vld [vmem:[#allocation2 + $0xc8] sm:$0xff] }
  0x17   :  { %163 = vmatprep.subr.mxu0 %v59_v9  ;;  %686 = vmatpush1.msra.mxu1 %v368_v21  ;;  %v364_v26 = vld [vmem:[#allocation2 + $0xc0] sm:$0xff]  ;;  %v37_v27 = vld [vmem:[%s1144_s0 + $0x10] sm:$0xff]  ;;  %v363_v28 = vld [vmem:[#allocation2 + $0xb8] sm:$0xff] }
  0x18   :  { %164 = vmatpush1.msra.mxu0 %v58_v10  ;;  %655 = vmatprep.subr.mxu1 %v367_v22  ;;  %v362_v29 = vld [vmem:[#allocation2 + $0xb0] sm:$0xff]  ;;  %v361_v30 = vld [vmem:[#allocation2 + $0xa8] sm:$0xff]  ;;  %v360_v31 = vld [vmem:[#allocation2 + $0xa0] sm:$0xff] }
  0x19   :  { %165 = vmatprep.subr.mxu0 %v57_v11  ;;  %687 = vmatpush1.msra.mxu1 %v366_v24  ;;  %v38_v32 = vld [vmem:[%s1144_s0 + $0x18] sm:$0xff]  ;;  %v358_v34 = vld [vmem:[#allocation2 + $0x90] sm:$0xff]  ;;  %v357_v35 = vld [vmem:[#allocation2 + $0x88] sm:$0xff] }
  0x1a   :  { %166 = vmatpush1.msra.mxu0 %v56_v12  ;;  %656 = vmatprep.subr.mxu1 %v365_v25  ;;  %v359_v33 = vld [vmem:[#allocation2 + $0x98] sm:$0xff]  ;;  %v356_v36 = vld [vmem:[#allocation2 + $0x80] sm:$0xff]  ;;  %v354_v39 = vld [vmem:[#allocation2 + $0x70] sm:$0xff] }
  0x1b   :  { %167 = vmatprep.subr.mxu0 %v55_v13  ;;  %688 = vmatpush1.msra.mxu1 %v364_v26  ;;  %v39_v37 = vld [vmem:[%s1144_s0 + $0x20] sm:$0xff]  ;;  %v355_v38 = vld [vmem:[#allocation2 + $0x78] sm:$0xff]  ;;  %v353_v40 = vld [vmem:[#allocation2 + $0x68] sm:$0xff] }
  0x1c   :  { %168 = vmatpush1.msra.mxu0 %v54_v14  ;;  %657 = vmatprep.subr.mxu1 %v363_v28  ;;  %v352_v41 = vld [vmem:[#allocation2 + $0x60] sm:$0xff]  ;;  %v40_v42 = vld [vmem:[%s1144_s0 + $0x28] sm:$0xff]  ;;  %v351_v43 = vld [vmem:[#allocation2 + $0x58] sm:$0xff] }
  0x1d   :  { %169 = vmatprep.subr.mxu0 %v53_v16  ;;  %689 = vmatpush1.msra.mxu1 %v362_v29  ;;  %v350_v44 = vld [vmem:[#allocation2 + $0x50] sm:$0xff]  ;;  %v349_v45 = vld [vmem:[#allocation2 + $0x48] sm:$0xff]  ;;  %v348_v46 = vld [vmem:[#allocation2 + $0x40] sm:$0xff] }
  0x1e   :  { %170 = vmatpush1.msra.mxu0 %v52_v18  ;;  %658 = vmatprep.subr.mxu1 %v361_v30  ;;  %v41_v47 = vld [vmem:[%s1144_s0 + $0x30] sm:$0xff]  ;;  %v347_v48 = vld [vmem:[#allocation2 + $0x38] sm:$0xff]  ;;  %v891_v50 = vld [vmem:[#allocation2 + $0x28] sm:$0xff] }
  0x1f   :  { %636 = vmatmul.mubr.msk.f32.vlgmr.msra.gmra.mxu0 %vm80_vm1, %v35_v20  ;;  %416 = vmatprep.subr.mxu0 %v371_v15  ;;  %v889_v49 = vld [vmem:[#allocation2 + $0x30] sm:$0xff]  ;;  %v894_v51 = vld [vmem:[#allocation2 + $0x20] sm:$0xff]  ;;  %v42_v52 = vld [vmem:[%s1144_s0 + $0x38] sm:$0xff] }
  0x20   :  { %209 = vmatprep.mubr.f32.mxu0 %v769_v0  ;;  %417 = vmatpush1.msra.mxu0 %v370_v17  ;;  %v901_v53 = vld [vmem:[#allocation2 + $0x18] sm:$0xff]  ;;  %v904_v54 = vld [vmem:[#allocation2 + $0x10] sm:$0xff]  ;;  %v907_v55 = vld [vmem:[#allocation2 + $0x8] sm:$0xff] }
  0x21   :  { %418 = vmatprep.subr.mxu0 %v369_v19  ;;  %690 = vmatpush1.msra.mxu1 %v360_v31  ;;  %v911_v56 = vld [vmem:[#allocation2] sm:$0xff]  ;;  %v918_v58 = vld [vmem:[#allocation2 + $0x1f8] sm:$0xff]  ;;  %v921_v59 = vld [vmem:[#allocation2 + $0x1f0] sm:$0xff] }
  0x22   :  { %419 = vmatpush1.msra.mxu0 %v368_v21  ;;  %659 = vmatprep.subr.mxu1 %v359_v33  ;;  %v43_v57 = vld [vmem:[%s1144_s0 + $0x40] sm:$0xff]  ;;  %v924_v60 = vld [vmem:[#allocation2 + $0x1e8] sm:$0xff]  ;;  %v935_v63 = vld [vmem:[#allocation2 + $0x1d8] sm:$0xff] }
  0x23   :  { %637 = vmatmul.mubr.msk.f32.gmra.mxu0 %vm80_vm1, %v36_v23  ;;  %420 = vmatprep.subr.mxu0 %v367_v22  ;;  %v928_v61 = vld [vmem:[#allocation2 + $0x1e0] sm:$0xff]  ;;  %v44_v62 = vld [vmem:[%s1144_s0 + $0x48] sm:$0xff]  ;;  %v938_v1 = vld [vmem:[#allocation2 + $0x1d0] sm:$0xff] }
  0x24   :  { %215 = vmatprep.mubr.f32.mxu0 %v769_v0  ;;  %421 = vmatpush1.msra.mxu0 %v366_v24  ;;  %v941_v2 = vld [vmem:[#allocation2 + $0x1c8] sm:$0xff]  ;;  %v945_v3 = vld [vmem:[#allocation2 + $0x1c0] sm:$0xff]  ;;  %v45_v4 = vld [vmem:[%s1144_s0 + $0x50] sm:$0xff] }
  0x25   :  { %422 = vmatprep.subr.mxu0 %v365_v25  ;;  %691 = vmatpush1.msra.mxu1 %v358_v34  ;;  %v952_v5 = vld [vmem:[#allocation2 + $0x1b8] sm:$0xff]  ;;  %v955_v6 = vld [vmem:[#allocation2 + $0x1b0] sm:$0xff]  ;;  %v958_v7 = vld [vmem:[#allocation2 + $0x1a8] sm:$0xff] }
  0x26   :  { %423 = vmatpush1.msra.mxu0 %v364_v26  ;;  %660 = vmatprep.subr.mxu1 %v357_v35  ;;  %v962_v8 = vld [vmem:[#allocation2 + $0x1a0] sm:$0xff]  ;;  %v46_v9 = vld [vmem:[%s1144_s0 + $0x58] sm:$0xff]  ;;  %v972_v11 = vld [vmem:[#allocation2 + $0x190] sm:$0xff] }
  0x27   :  { %638 = vmatmul.mubr.msk.f32.gmra.mxu0 %vm80_vm1, %v37_v27  ;;  %424 = vmatprep.subr.mxu0 %v363_v28  ;;  %v969_v10 = vld [vmem:[#allocation2 + $0x198] sm:$0xff]  ;;  %v976_v12 = vld [vmem:[#allocation2 + $0x188] sm:$0xff]  ;;  %v981_v13 = vld [vmem:[#allocation2 + $0x180] sm:$0xff] }
  0x28   :  { %221 = vmatprep.mubr.f32.mxu0 %v769_v0  ;;  %425 = vmatpush1.msra.mxu0 %v362_v29  ;;  %v47_v14 = vld [vmem:[%s1144_s0 + $0x60] sm:$0xff]  ;;  %v988_v15 = vld [vmem:[#allocation2 + $0x178] sm:$0xff]  ;;  %v991_v16 = vld [vmem:[#allocation2 + $0x170] sm:$0xff] }
  0x29   :  { %426 = vmatprep.subr.mxu0 %v361_v30  ;;  %692 = vmatpush1.msra.mxu1 %v356_v36  ;;  %v995_v17 = vld [vmem:[#allocation2 + $0x168] sm:$0xff]  ;;  %v384_v18 = vld [vmem:[#allocation2 + $0x160] sm:$0xff]  ;;  %v383_v20 = vld [vmem:[#allocation2 + $0x158] sm:$0xff] }
  0x2a   :  { %427 = vmatpush1.msra.mxu0 %v360_v31  ;;  %661 = vmatprep.subr.mxu1 %v355_v38  ;;  %v48_v19 = vld [vmem:[%s1144_s0 + $0x68] sm:$0xff]  ;;  %v382_v21 = vld [vmem:[#allocation2 + $0x150] sm:$0xff]  ;;  %v380_v23 = vld [vmem:[#allocation2 + $0x140] sm:$0xff] }
  0x2b   :  { %639 = vmatmul.mubr.msk.f32.gmra.mxu0 %vm80_vm1, %v38_v32  ;;  %428 = vmatprep.subr.mxu0 %v359_v33  ;;  %v381_v22 = vld [vmem:[#allocation2 + $0x148] sm:$0xff]  ;;  %v49_v24 = vld [vmem:[%s1144_s0 + $0x70] sm:$0xff]  ;;  %v50_v25 = vld [vmem:[%s1144_s0 + $0x78] sm:$0xff] }
  0x2c   :  { %227 = vmatprep.mubr.f32.mxu0 %v769_v0  ;;  %429 = vmatpush1.msra.mxu0 %v358_v34  ;;  %v51_v26 = vld [vmem:[%s1144_s0 + $0x80] sm:$0xff]  ;;  %v379_v27 = vld [vmem:[#allocation2 + $0x138] sm:$0xff]  ;;  %v378_v28 = vld [vmem:[#allocation2 + $0x130] sm:$0xff]  ;;  %v70_v34 = vlaneseq }
  0x2d   :  { %430 = vmatprep.subr.mxu0 %v357_v35  ;;  %693 = vmatpush1.msra.mxu1 %v354_v39  ;;  %v377_v29 = vld [vmem:[#allocation2 + $0x128] sm:$0xff]  ;;  %v375_v30 = vld [vmem:[#allocation2 + $0x118] sm:$0xff]  ;;  %v374_v31 = vld [vmem:[#allocation2 + $0x110] sm:$0xff] }
  0x2e   :  { %431 = vmatpush1.msra.mxu0 %v356_v36  ;;  %662 = vmatprep.subr.mxu1 %v353_v40  ;;  %v373_v32 = vld [vmem:[#allocation2 + $0x108] sm:$0xff]  ;;  %v372_v33 = vld [vmem:[#allocation2 + $0x100] sm:$0xff]  ;;  %v1044_v35 = vshrl.u32 %v70_v34, 7 }
  0x2f   :  { %640 = vmatmul.mubr.msk.f32.gmra.mxu0 %vm80_vm1, %v39_v37  ;;  %432 = vmatprep.subr.mxu0 %v355_v38  ;;  %v68_v37 = vld [vmem:[%s1146_s2] sm:$0x3] }
  0x30   :  { %233 = vmatprep.mubr.f32.mxu0 %v769_v0  ;;  %433 = vmatpush1.msra.mxu0 %v354_v39  ;;  %v72_v36 = vsub.s32 0, %v1044_v35  ;;  %v76_v38 = vsub.s32 1, %v1044_v35 }
  0x31   :  { %434 = vmatprep.subr.mxu0 %v353_v40  ;;  %694 = vmatpush1.msra.mxu1 %v352_v41 }
  0x32   :  { %435 = vmatpush1.msra.mxu0 %v352_v41  ;;  %663 = vmatprep.subr.mxu1 %v351_v43  ;;  %v1053_v39 = vrot.slane %v68_v37, %v72_v36  ;;  %v1057_v40 = vrot.slane %v68_v37, %v76_v38 }
  0x33   :  { %641 = vmatmul.mubr.msk.f32.gmra.mxu0 %vm80_vm1, %v40_v42  ;;  %436 = vmatprep.subr.mxu0 %v351_v43 }
  0x34   :  { %239 = vmatprep.mubr.f32.mxu0 %v769_v0  ;;  %437 = vmatpush1.msra.mxu0 %v350_v44 }
  0x35   :  { %438 = vmatprep.subr.mxu0 %v349_v45  ;;  %695 = vmatpush1.msra.mxu1 %v350_v44 }
  0x36   :  { %439 = vmatpush1.msra.mxu0 %v348_v46  ;;  %664 = vmatprep.subr.mxu1 %v349_v45 }
  0x37   :  { %642 = vmatmul.mubr.msk.f32.gmra.mxu0 %vm80_vm1, %v41_v47  ;;  %440 = vmatprep.subr.mxu0 %v347_v48 }
  0x38   :  { %245 = vmatprep.mubr.f32.mxu0 %v769_v0  ;;  %441 = vmatpush1.msra.mxu0 %v889_v49 }
  0x39   :  { %442 = vmatprep.subr.mxu0 %v891_v50  ;;  %696 = vmatpush1.msra.mxu1 %v348_v46 }
  0x3a   :  { %443 = vmatpush1.msra.mxu0 %v894_v51  ;;  %665 = vmatprep.subr.mxu1 %v347_v48 }
  0x3b   :  { %643 = vmatmul.mubr.msk.f32.gmra.mxu0 %vm80_vm1, %v42_v52  ;;  %444 = vmatprep.subr.mxu0 %v901_v53 }
  0x3c   :  { %251 = vmatprep.mubr.f32.mxu0 %v769_v0  ;;  %445 = vmatpush1.msra.mxu0 %v904_v54 }
  0x3d   :  { %446 = vmatprep.subr.mxu0 %v907_v55  ;;  %697 = vmatpush1.msra.mxu1 %v889_v49 }
  0x3e   :  { %447 = vmatpush1.msra.mxu0 %v911_v56  ;;  %666 = vmatprep.subr.mxu1 %v891_v50 }
  0x3f   :  { %644 = vmatmul.mubr.msk.f32.gmra.mxu0 %vm80_vm1, %v43_v57  ;;  %448 = vmatprep.subr.mxu0 %v918_v58 }
  0x40   :  { %257 = vmatprep.mubr.f32.mxu0 %v769_v0  ;;  %449 = vmatpush2.msra.mxu0 %v921_v59 }
  0x41   :  { %450 = vmatprep.subr.mxu0 %v924_v60  ;;  %698 = vmatpush1.msra.mxu1 %v894_v51 }
  0x42   :  { %451 = vmatpush2.msra.mxu0 %v928_v61  ;;  %667 = vmatprep.subr.mxu1 %v901_v53 }
  0x43   :  { %645 = vmatmul.mubr.msk.f32.gmra.mxu0 %vm80_vm1, %v44_v62  ;;  %452 = vmatprep.subr.mxu0 %v935_v63 }
  0x44   :  { %263 = vmatprep.mubr.f32.mxu0 %v769_v0  ;;  %453 = vmatpush2.msra.mxu0 %v938_v1 }
  0x45   :  { %454 = vmatprep.subr.mxu0 %v941_v2  ;;  %699 = vmatpush1.msra.mxu1 %v904_v54 }
  0x46   :  { %455 = vmatpush2.msra.mxu0 %v945_v3  ;;  %668 = vmatprep.subr.mxu1 %v907_v55 }
  0x47   :  { %646 = vmatmul.mubr.msk.f32.gmra.mxu0 %vm80_vm1, %v45_v4  ;;  %456 = vmatprep.subr.mxu0 %v952_v5 }
  0x48   :  { %269 = vmatprep.mubr.f32.mxu0 %v769_v0  ;;  %457 = vmatpush2.msra.mxu0 %v955_v6 }
  0x49   :  { %458 = vmatprep.subr.mxu0 %v958_v7  ;;  %700 = vmatpush1.msra.mxu1 %v911_v56 }
  0x4a   :  { %459 = vmatpush2.msra.mxu0 %v962_v8  ;;  %669 = vmatprep.subr.mxu1 %v918_v58 }
  0x4b   :  { %647 = vmatmul.mubr.msk.f32.gmra.mxu0 %vm80_vm1, %v46_v9  ;;  %460 = vmatprep.subr.mxu0 %v969_v10 }
  0x4c   :  { %275 = vmatprep.mubr.f32.mxu0 %v769_v0  ;;  %461 = vmatpush2.msra.mxu0 %v972_v11 }
  0x4d   :  { %462 = vmatprep.subr.mxu0 %v976_v12  ;;  %701 = vmatpush2.msra.mxu1 %v921_v59 }
  0x4e   :  { %463 = vmatpush2.msra.mxu0 %v981_v13  ;;  %670 = vmatprep.subr.mxu1 %v924_v60 }
  0x4f   :  { %648 = vmatmul.mubr.msk.f32.gmra.mxu0 %vm80_vm1, %v47_v14  ;;  %464 = vmatprep.subr.mxu0 %v988_v15 }
  0x50   :  { %281 = vmatprep.mubr.f32.mxu0 %v769_v0  ;;  %465 = vmatpush2.msra.mxu0 %v991_v16 }
  0x51   :  { %466 = vmatprep.subr.mxu0 %v995_v17  ;;  %702 = vmatpush2.msra.mxu1 %v928_v61 }
  0x52   :  { %467 = vmatpush2.msra.mxu0 %v384_v18  ;;  %671 = vmatprep.subr.mxu1 %v935_v63 }
  0x53   :  { %649 = vmatmul.mubr.msk.f32.gmra.mxu0 %vm80_vm1, %v48_v19  ;;  %468 = vmatprep.subr.mxu0 %v383_v20 }
  0x54   :  { %287 = vmatprep.mubr.f32.mxu0 %v769_v0  ;;  %469 = vmatpush2.msra.mxu0 %v382_v21 }
  0x55   :  { %470 = vmatprep.subr.mxu0 %v381_v22  ;;  %703 = vmatpush2.msra.mxu1 %v938_v1 }
  0x56   :  { %471 = vmatpush2.msra.mxu0 %v380_v23  ;;  %672 = vmatprep.subr.mxu1 %v941_v2 }
  0x57   :  { %650 = vmatmul.mubr.msk.f32.gmra.mxu0 %vm80_vm1, %v49_v24  ;;  %704 = vmatpush2.msra.mxu1 %v945_v3 }
  0x58   :  { %293 = vmatprep.mubr.f32.mxu0 %v769_v0  ;;  %673 = vmatprep.subr.mxu1 %v952_v5 }
  0x59   :  { %472 = vmatprep.subr.mxu0 %v379_v27  ;;  %705 = vmatpush2.msra.mxu1 %v955_v6 }
  0x5a   :  { %473 = vmatpush2.msra.mxu0 %v378_v28  ;;  %674 = vmatprep.subr.mxu1 %v958_v7 }
  0x5b   :  { %651 = vmatmul.mubr.msk.f32.gmra.mxu0 %vm80_vm1, %v50_v25  ;;  %474 = vmatprep.subr.mxu0 %v377_v29 }
  0x5c   :  { %299 = vmatprep.mubr.f32.mxu0 %v769_v0  ;;  %v376_v0 = vld [vmem:[#allocation2 + $0x120] sm:$0xff]  ;;  %706 = vmatpush2.msra.mxu1 %v962_v8 }
  0x5d   :  { %475 = vmatpush2.msra.mxu0 %v376_v0  ;;  %675 = vmatprep.subr.mxu1 %v969_v10 }
  0x5e   :  { %476 = vmatprep.subr.mxu0 %v375_v30  ;;  %707 = vmatpush2.msra.mxu1 %v972_v11 }
  0x5f   :  { %652 = vmatmul.mubr.msk.f32.gmra.mxu0 %vm80_vm1, %v51_v26  ;;  %676 = vmatprep.subr.mxu1 %v976_v12 }
  0x60   :  { %477 = vmatpush2.msra.mxu0 %v374_v31  ;;  %708 = vmatpush2.msra.mxu1 %v981_v13 }
  0x61   :  { %478 = vmatprep.subr.mxu0 %v373_v32  ;;  %677 = vmatprep.subr.mxu1 %v988_v15 }
  0x62   :  { %479 = vmatpush2.msra.mxu0 %v372_v33  ;;  %709 = vmatpush2.msra.mxu1 %v991_v16 }
  0x63   :  { %678 = vmatprep.subr.mxu1 %v995_v17 }
  0x64   :  { %710 = vmatpush2.msra.mxu1 %v384_v18 }
  0x65   :  { %679 = vmatprep.subr.mxu1 %v383_v20 }
  0x66   :  { %711 = vmatpush2.msra.mxu1 %v382_v21 }
  0x67   :  { %680 = vmatprep.subr.mxu1 %v381_v22 }
  0x68   :  { %712 = vmatpush2.msra.mxu1 %v380_v23 }
  0x69   :  { %681 = vmatprep.subr.mxu1 %v379_v27 }
  0x6a   :  { %713 = vmatpush2.msra.mxu1 %v378_v28 }
  0x6b   :  { %682 = vmatprep.subr.mxu1 %v377_v29 }
  0x6c   :  { %714 = vmatpush2.msra.mxu1 %v376_v0 }
  0x6d   :  { %683 = vmatprep.subr.mxu1 %v375_v30 }
  0x6e   :  { %715 = vmatpush2.msra.mxu1 %v374_v31 }
  0x6f   :  { %684 = vmatprep.subr.mxu1 %v373_v32 }
  0x70   :  { %716 = vmatpush2.msra.mxu1 %v372_v33 }
  0xdf   :  { %v205_v41 = vpop.f32.mrf.mxu0 }
  0xe0   :  { %v206_v42 = vadd.f32 %v205_v41, %v1053_v39 }
  0xe1   :  { %v207_v43 = vpop.f32.mrf.mxu0 }
  0xe2   :  { %v208_v44 = vadd.f32 %v207_v43, %v1057_v40  ;;  %v306_v47 = vmax.f32 %v206_v42, 0.0 }
  0xe3   :  { %v211_v45 = vpop.f32.mrf.mxu0 }
  0xe4   :  { %v307_v46 = vmax.f32 %v208_v44, 0.0  ;;  %v212_v48 = vadd.f32 %v211_v45, %v1053_v39 }
  0xe5   :  { %v213_v49 = vpop.f32.mrf.mxu0 }
  0xe6   :  { %v214_v50 = vadd.f32 %v213_v49, %v1057_v40  ;;  %480 = vmatprep.mubr.f32.mxu0 %v307_v46  ;;  %v308_v53 = vmax.f32 %v212_v48, 0.0 }
  0xe7   :  { %v217_v51 = vpop.f32.mrf.mxu0  ;;  %481 = vmatmul.mubr.f32.vlgmr.msra.gmra.mxu0 %v306_v47 }
  0xe8   :  { %v309_v52 = vmax.f32 %v214_v50, 0.0  ;;  %v218_v54 = vadd.f32 %v217_v51, %v1053_v39 }
  0xe9   :  { %v219_v55 = vpop.f32.mrf.mxu0 }
  0xea   :  { %v220_v56 = vadd.f32 %v219_v55, %v1057_v40  ;;  %486 = vmatprep.mubr.f32.mxu0 %v309_v52  ;;  %v310_v59 = vmax.f32 %v218_v54, 0.0 }
  0xeb   :  { %v223_v57 = vpop.f32.mrf.mxu0  ;;  %487 = vmatmul.mubr.f32.gmra.mxu0 %v308_v53 }
  0xec   :  { %v311_v58 = vmax.f32 %v220_v56, 0.0  ;;  %v224_v60 = vadd.f32 %v223_v57, %v1053_v39 }
  0xed   :  { %v225_v61 = vpop.f32.mrf.mxu0 }
  0xee   :  { %v226_v62 = vadd.f32 %v225_v61, %v1057_v40  ;;  %492 = vmatprep.mubr.f32.mxu0 %v311_v58  ;;  %v312_v2 = vmax.f32 %v224_v60, 0.0 }
  0xef   :  { %v229_v63 = vpop.f32.mrf.mxu0  ;;  %493 = vmatmul.mubr.f32.gmra.mxu0 %v310_v59 }
  0xf0   :  { %v313_v1 = vmax.f32 %v226_v62, 0.0  ;;  %v230_v3 = vadd.f32 %v229_v63, %v1053_v39 }
  0xf1   :  { %v231_v4 = vpop.f32.mrf.mxu0 }
  0xf2   :  { %v232_v5 = vadd.f32 %v231_v4, %v1057_v40  ;;  %498 = vmatprep.mubr.f32.mxu0 %v313_v1  ;;  %v314_v8 = vmax.f32 %v230_v3, 0.0 }
  0xf3   :  { %v235_v6 = vpop.f32.mrf.mxu0  ;;  %499 = vmatmul.mubr.f32.gmra.mxu0 %v312_v2 }
  0xf4   :  { %v315_v7 = vmax.f32 %v232_v5, 0.0  ;;  %v236_v9 = vadd.f32 %v235_v6, %v1053_v39 }
  0xf5   :  { %v237_v10 = vpop.f32.mrf.mxu0 }
  0xf6   :  { %v238_v11 = vadd.f32 %v237_v10, %v1057_v40  ;;  %504 = vmatprep.mubr.f32.mxu0 %v315_v7  ;;  %v316_v14 = vmax.f32 %v236_v9, 0.0 }
  0xf7   :  { %v241_v12 = vpop.f32.mrf.mxu0  ;;  %505 = vmatmul.mubr.f32.gmra.mxu0 %v314_v8 }
  0xf8   :  { %v317_v13 = vmax.f32 %v238_v11, 0.0  ;;  %v242_v15 = vadd.f32 %v241_v12, %v1053_v39 }
  0xf9   :  { %v243_v16 = vpop.f32.mrf.mxu0 }
  0xfa   :  { %510 = vmatprep.mubr.f32.mxu0 %v317_v13  ;;  %v244_v17 = vadd.f32 %v243_v16, %v1057_v40  ;;  %v318_v20 = vmax.f32 %v242_v15, 0.0 }
  0xfb   :  { %v247_v18 = vpop.f32.mrf.mxu0  ;;  %511 = vmatmul.mubr.f32.gmra.mxu0 %v316_v14 }
  0xfc   :  { %v319_v19 = vmax.f32 %v244_v17, 0.0  ;;  %v248_v21 = vadd.f32 %v247_v18, %v1053_v39 }
  0xfd   :  { %v249_v22 = vpop.f32.mrf.mxu0 }
  0xfe   :  { %v250_v23 = vadd.f32 %v249_v22, %v1057_v40  ;;  %516 = vmatprep.mubr.f32.mxu1 %v319_v19  ;;  %v320_v26 = vmax.f32 %v248_v21, 0.0  ;;  %v404_v21 = vld [vmem:[%s1148_s4] sm:$0x3]  ;;  %s770_s4 = smov [#allocation5]  }
  0xff   :  { %v253_v24 = vpop.f32.mrf.mxu0  ;;  %517 = vmatmul.mubr.f32.vlgmr.msra.gmra.mxu1 %v318_v20  ;;  %v1098_v22 = vrot.slane %v404_v21, %v72_v36  ;;  %s622_s17 = sshll.u32 %s770_s4, 4  ;;  %s623_s17 = int_to_ptr.vmem [resolvable:$true] %s622_s17 }
 0x100   :  { %v321_v25 = vmax.f32 %v250_v23, 0.0  ;;  %v254_v27 = vadd.f32 %v253_v24, %v1053_v39  ;;  %s742_s18 = scalar_lea.vmem %s623_s17, 4352  ;;  %p747_p6 = scmp.lt.s32.totalorder %s623_s17, %s623_s17 }
 0x101   :  { %v255_v28 = vpop.f32.mrf.mxu0  ;;  %p743_p5 = scmp.ne.s32.totalorder %s623_s17, %s742_s18  ;;  %p748_p7 = scmp.lt.s32.totalorder %s742_s18, %s742_s18 }
 0x102   :  { %v256_v29 = vadd.f32 %v255_v28, %v1057_v40  ;;  %522 = vmatprep.mubr.f32.mxu1 %v321_v25  ;;  %v322_v31 = vmax.f32 %v254_v27, 0.0 }
 0x103   :  { %v259_v0 = vpop.f32.mrf.mxu0  ;;  %523 = vmatmul.mubr.f32.gmra.mxu1 %v320_v26  ;;  %p749_p8 = por %p748_p7, %p747_p6 }
 0x104   :  { %v323_v30 = vmax.f32 %v256_v29, 0.0  ;;  %v260_v32 = vadd.f32 %v259_v0, %v1053_v39 }
 0x105   :  { %v261_v33 = vpop.f32.mrf.mxu0  ;;  %p750_p9 = pnand %p749_p8, %p743_p5 }
 0x106   :  { %v262_v34 = vadd.f32 %v261_v33, %v1057_v40  ;;  %528 = vmatprep.mubr.f32.mxu1 %v323_v30  ;;  %v324_v42 = vmax.f32 %v260_v32, 0.0 }
 0x107   :  { %v265_v37 = vpop.f32.mrf.mxu0  ;;  %529 = vmatmul.mubr.f32.gmra.mxu1 %v322_v31 }
 0x108   :  { %v325_v41 = vmax.f32 %v262_v34, 0.0  ;;  %v266_v43 = vadd.f32 %v265_v37, %v1053_v39 }
 0x109   :  { %v267_v44 = vpop.f32.mrf.mxu0 }
 0x10a   :  { %v268_v45 = vadd.f32 %v267_v44, %v1057_v40  ;;  %534 = vmatprep.mubr.f32.mxu1 %v325_v41  ;;  %v326_v48 = vmax.f32 %v266_v43, 0.0 }
 0x10b   :  { %v271_v46 = vpop.f32.mrf.mxu0  ;;  %535 = vmatmul.mubr.f32.gmra.mxu1 %v324_v42 }
 0x10c   :  { %v327_v47 = vmax.f32 %v268_v45, 0.0  ;;  %v272_v49 = vadd.f32 %v271_v46, %v1053_v39 }
 0x10d   :  { %v273_v50 = vpop.f32.mrf.mxu0 }
 0x10e   :  { %v274_v51 = vadd.f32 %v273_v50, %v1057_v40  ;;  %540 = vmatprep.mubr.f32.mxu1 %v327_v47  ;;  %v328_v54 = vmax.f32 %v272_v49, 0.0 }
 0x10f   :  { %v277_v52 = vpop.f32.mrf.mxu0  ;;  %541 = vmatmul.mubr.f32.gmra.mxu1 %v326_v48 }
 0x110   :  { %v329_v53 = vmax.f32 %v274_v51, 0.0  ;;  %v278_v55 = vadd.f32 %v277_v52, %v1053_v39 }
 0x111   :  { %v279_v56 = vpop.f32.mrf.mxu0 }
 0x112   :  { %v280_v57 = vadd.f32 %v279_v56, %v1057_v40  ;;  %546 = vmatprep.mubr.f32.mxu1 %v329_v53  ;;  %v330_v60 = vmax.f32 %v278_v55, 0.0 }
 0x113   :  { %v283_v58 = vpop.f32.mrf.mxu0  ;;  %547 = vmatmul.mubr.f32.gmra.mxu1 %v328_v54 }
 0x114   :  { %v331_v59 = vmax.f32 %v280_v57, 0.0  ;;  %v284_v61 = vadd.f32 %v283_v58, %v1053_v39 }
 0x115   :  { %v285_v62 = vpop.f32.mrf.mxu0 }
 0x116   :  { %v286_v63 = vadd.f32 %v285_v62, %v1057_v40  ;;  %552 = vmatprep.mubr.f32.mxu1 %v331_v59  ;;  %v332_v3 = vmax.f32 %v284_v61, 0.0 }
 0x117   :  { %v289_v1 = vpop.f32.mrf.mxu0  ;;  %553 = vmatmul.mubr.f32.gmra.mxu1 %v330_v60 }
 0x118   :  { %v333_v2 = vmax.f32 %v286_v63, 0.0  ;;  %v290_v4 = vadd.f32 %v289_v1, %v1053_v39 }
 0x119   :  { %v291_v5 = vpop.f32.mrf.mxu0 }
 0x11a   :  { %v292_v6 = vadd.f32 %v291_v5, %v1057_v40  ;;  %558 = vmatprep.mubr.f32.mxu1 %v333_v2  ;;  %v334_v9 = vmax.f32 %v290_v4, 0.0 }
 0x11b   :  { %v295_v7 = vpop.f32.mrf.mxu0  ;;  %559 = vmatmul.mubr.f32.gmra.mxu1 %v332_v3 }
 0x11c   :  { %v335_v8 = vmax.f32 %v292_v6, 0.0  ;;  %v296_v10 = vadd.f32 %v295_v7, %v1053_v39 }
 0x11d   :  { %v297_v11 = vpop.f32.mrf.mxu0 }
 0x11e   :  { %v298_v12 = vadd.f32 %v297_v11, %v1057_v40  ;;  %564 = vmatprep.mubr.f32.mxu1 %v335_v8  ;;  %v336_v15 = vmax.f32 %v296_v10, 0.0 }
 0x11f   :  { %v301_v13 = vpop.f32.mrf.mxu0  ;;  %565 = vmatmul.mubr.f32.gmra.mxu1 %v334_v9 }
 0x120   :  { %v337_v14 = vmax.f32 %v298_v12, 0.0  ;;  %v302_v16 = vadd.f32 %v301_v13, %v1053_v39  ;;  %v1102_v39 = vrot.slane %v404_v21, %v76_v38 }
 0x121   :  { %v303_v17 = vpop.f32.mrf.mxu0 }
 0x122   :  { %v304_v18 = vadd.f32 %v303_v17, %v1057_v40  ;;  %570 = vmatprep.mubr.f32.mxu1 %v337_v14  ;;  %v338_v20 = vmax.f32 %v302_v16, 0.0 }
 0x123   :  { %571 = vmatmul.mubr.f32.gmra.mxu1 %v336_v15 }
 0x124   :  { %v339_v19 = vmax.f32 %v304_v18, 0.0 }
 0x126   :  { %576 = vmatprep.mubr.f32.mxu1 %v339_v19 }
 0x127   :  { %577 = vmatmul.mubr.f32.gmra.mxu1 %v338_v20 }
 0x1a7   :  { %v482_v23 = vpop.f32.mrf.mxu0 }
 0x1a8   :  { %v483_v40 = vadd.f32 %v482_v23, %v1098_v22 }
 0x1a9   :  { %v484_v24 = vpop.f32.mrf.mxu0 }
 0x1aa   :  { %583 = vst [vmem:[#allocation5] sm:$0xff] %v483_v40  ;;  %v485_v25 = vadd.f32 %v484_v24, %v1102_v39 }
 0x1ab   :  { %v488_v26 = vpop.f32.mrf.mxu0 }
 0x1ac   :  { %584 = vst [vmem:[#allocation5 + $0x8] sm:$0xff] %v485_v25  ;;  %v489_v27 = vadd.f32 %v488_v26, %v1098_v22 }
 0x1ad   :  { %v490_v28 = vpop.f32.mrf.mxu0 }
 0x1ae   :  { %585 = vst [vmem:[#allocation5 + $0x10] sm:$0xff] %v489_v27  ;;  %v491_v36 = vadd.f32 %v490_v28, %v1102_v39 }
 0x1af   :  { %v494_v29 = vpop.f32.mrf.mxu0 }
 0x1b0   :  { %586 = vst [vmem:[#allocation5 + $0x18] sm:$0xff] %v491_v36  ;;  %v495_v35 = vadd.f32 %v494_v29, %v1098_v22 }
 0x1b1   :  { %v496_v38 = vpop.f32.mrf.mxu0 }
 0x1b2   :  { %587 = vst [vmem:[#allocation5 + $0x20] sm:$0xff] %v495_v35  ;;  %v497_v0 = vadd.f32 %v496_v38, %v1102_v39 }
 0x1b3   :  { %v500_v30 = vpop.f32.mrf.mxu0 }
 0x1b4   :  { %588 = vst [vmem:[#allocation5 + $0x28] sm:$0xff] %v497_v0  ;;  %v501_v31 = vadd.f32 %v500_v30, %v1098_v22 }
 0x1b5   :  { %v502_v32 = vpop.f32.mrf.mxu0 }
 0x1b6   :  { %589 = vst [vmem:[#allocation5 + $0x30] sm:$0xff] %v501_v31  ;;  %v503_v33 = vadd.f32 %v502_v32, %v1102_v39 }
 0x1b7   :  { %v506_v34 = vpop.f32.mrf.mxu0 }
 0x1b8   :  { %590 = vst [vmem:[#allocation5 + $0x38] sm:$0xff] %v503_v33  ;;  %v507_v37 = vadd.f32 %v506_v34, %v1098_v22 }
 0x1b9   :  { %v508_v41 = vpop.f32.mrf.mxu0 }
 0x1ba   :  { %591 = vst [vmem:[#allocation5 + $0x40] sm:$0xff] %v507_v37  ;;  %v509_v42 = vadd.f32 %v508_v41, %v1102_v39 }
 0x1bb   :  { %v512_v43 = vpop.f32.mrf.mxu0 }
 0x1bc   :  { %592 = vst [vmem:[#allocation5 + $0x48] sm:$0xff] %v509_v42  ;;  %v513_v44 = vadd.f32 %v512_v43, %v1098_v22 }
 0x1bd   :  { %v514_v45 = vpop.f32.mrf.mxu0 }
 0x1be   :  { %593 = vst [vmem:[#allocation5 + $0x50] sm:$0xff] %v513_v44  ;;  %v515_v46 = vadd.f32 %v514_v45, %v1102_v39 }
 0x1bf   :  { %v518_v47 = vpop.f32.mrf.mxu1 }
 0x1c0   :  { %594 = vst [vmem:[#allocation5 + $0x58] sm:$0xff] %v515_v46  ;;  %v519_v48 = vadd.f32 %v518_v47, %v1098_v22 }
 0x1c1   :  { %v520_v49 = vpop.f32.mrf.mxu1 }
 0x1c2   :  { %595 = vst [vmem:[#allocation5 + $0x60] sm:$0xff] %v519_v48  ;;  %v521_v50 = vadd.f32 %v520_v49, %v1102_v39 }
 0x1c3   :  { %v524_v51 = vpop.f32.mrf.mxu1 }
 0x1c4   :  { %596 = vst [vmem:[#allocation5 + $0x68] sm:$0xff] %v521_v50  ;;  %v525_v52 = vadd.f32 %v524_v51, %v1098_v22 }
 0x1c5   :  { %v526_v53 = vpop.f32.mrf.mxu1 }
 0x1c6   :  { %597 = vst [vmem:[#allocation5 + $0x70] sm:$0xff] %v525_v52  ;;  %v527_v54 = vadd.f32 %v526_v53, %v1102_v39 }
 0x1c7   :  { %v530_v55 = vpop.f32.mrf.mxu1 }
 0x1c8   :  { %598 = vst [vmem:[#allocation5 + $0x78] sm:$0xff] %v527_v54  ;;  %v531_v56 = vadd.f32 %v530_v55, %v1098_v22 }
 0x1c9   :  { %v532_v57 = vpop.f32.mrf.mxu1 }
 0x1ca   :  { %599 = vst [vmem:[#allocation5 + $0x80] sm:$0xff] %v531_v56  ;;  %v533_v58 = vadd.f32 %v532_v57, %v1102_v39 }
 0x1cb   :  { %v536_v59 = vpop.f32.mrf.mxu1 }
 0x1cc   :  { %600 = vst [vmem:[#allocation5 + $0x88] sm:$0xff] %v533_v58  ;;  %v537_v60 = vadd.f32 %v536_v59, %v1098_v22 }
 0x1cd   :  { %v538_v61 = vpop.f32.mrf.mxu1 }
 0x1ce   :  { %601 = vst [vmem:[#allocation5 + $0x90] sm:$0xff] %v537_v60  ;;  %v539_v62 = vadd.f32 %v538_v61, %v1102_v39 }
 0x1cf   :  { %v542_v63 = vpop.f32.mrf.mxu1 }
 0x1d0   :  { %602 = vst [vmem:[#allocation5 + $0x98] sm:$0xff] %v539_v62  ;;  %v543_v1 = vadd.f32 %v542_v63, %v1098_v22 }
 0x1d1   :  { %v544_v2 = vpop.f32.mrf.mxu1 }
 0x1d2   :  { %603 = vst [vmem:[#allocation5 + $0xa0] sm:$0xff] %v543_v1  ;;  %v545_v3 = vadd.f32 %v544_v2, %v1102_v39 }
 0x1d3   :  { %v548_v4 = vpop.f32.mrf.mxu1 }
 0x1d4   :  { %604 = vst [vmem:[#allocation5 + $0xa8] sm:$0xff] %v545_v3  ;;  %v549_v5 = vadd.f32 %v548_v4, %v1098_v22 }
 0x1d5   :  { %v550_v6 = vpop.f32.mrf.mxu1 }
 0x1d6   :  { %605 = vst [vmem:[#allocation5 + $0xb0] sm:$0xff] %v549_v5  ;;  %v551_v7 = vadd.f32 %v550_v6, %v1102_v39 }
 0x1d7   :  { %v554_v8 = vpop.f32.mrf.mxu1 }
 0x1d8   :  { %606 = vst [vmem:[#allocation5 + $0xb8] sm:$0xff] %v551_v7  ;;  %v555_v9 = vadd.f32 %v554_v8, %v1098_v22 }
 0x1d9   :  { %v556_v10 = vpop.f32.mrf.mxu1 }
 0x1da   :  { %607 = vst [vmem:[#allocation5 + $0xc0] sm:$0xff] %v555_v9  ;;  %v557_v11 = vadd.f32 %v556_v10, %v1102_v39 }
 0x1db   :  { %v560_v12 = vpop.f32.mrf.mxu1 }
 0x1dc   :  { %608 = vst [vmem:[#allocation5 + $0xc8] sm:$0xff] %v557_v11  ;;  %v561_v13 = vadd.f32 %v560_v12, %v1098_v22 }
 0x1dd   :  { %v562_v14 = vpop.f32.mrf.mxu1 }
 0x1de   :  { %609 = vst [vmem:[#allocation5 + $0xd0] sm:$0xff] %v561_v13  ;;  %v563_v15 = vadd.f32 %v562_v14, %v1102_v39 }
 0x1df   :  { %v566_v16 = vpop.f32.mrf.mxu1 }
 0x1e0   :  { %610 = vst [vmem:[#allocation5 + $0xd8] sm:$0xff] %v563_v15  ;;  %v567_v17 = vadd.f32 %v566_v16, %v1098_v22 }
 0x1e1   :  { %v568_v18 = vpop.f32.mrf.mxu1 }
 0x1e2   :  { %611 = vst [vmem:[#allocation5 + $0xe0] sm:$0xff] %v567_v17  ;;  %v569_v19 = vadd.f32 %v568_v18, %v1102_v39 }
 0x1e3   :  { %v572_v20 = vpop.f32.mrf.mxu1 }
 0x1e4   :  { %612 = vst [vmem:[#allocation5 + $0xe8] sm:$0xff] %v569_v19  ;;  %v573_v21 = vadd.f32 %v572_v20, %v1098_v22 }
 0x1e5   :  { %v574_v23 = vpop.f32.mrf.mxu1 }
 0x1e6   :  { %613 = vst [vmem:[#allocation5 + $0xf0] sm:$0xff] %v573_v21  ;;  %v575_v40 = vadd.f32 %v574_v23, %v1102_v39 }
 0x1e7   :  { %v578_v24 = vpop.f32.mrf.mxu1 }
 0x1e8   :  { %614 = vst [vmem:[#allocation5 + $0xf8] sm:$0xff] %v575_v40  ;;  %v579_v25 = vadd.f32 %v578_v24, %v1098_v22 }
 0x1e9   :  { %v580_v26 = vpop.f32.mrf.mxu1 }
 0x1ea   :  { %615 = vst [vmem:[#allocation5 + $0x100] sm:$0xff] %v579_v25  ;;  %v581_v27 = vadd.f32 %v580_v26, %v1102_v39 }
 0x1ec   :  { %616 = vst [vmem:[#allocation5 + $0x108] sm:$0xff] %v581_v27 }
 0x1ed   :  { %753 = shalt.err (!%p750_p9)
}
 0x1ee   :  { %628 = dma.vmem_to_hbm [thread:$0]  %s623_s17, 4352, %s1149_s5, [#allocation4], %s767_s21, %s767_s21, %s768_s22  }
 0x1ef   :  { %764 = dma.done.wait [#allocation4], 4352  }
 0x1f0   :  { %765 = vsyncadd [#allocation4], 4294962944 }
 0x1f1   :  { %632 = vsyncpa [#allocation3], 1 }
 0x1f2   :  { %633 = vsyncpa [#allocation4], 1 }

</bundles_post_ra>
